<compile_context>
chip_gen: v7x
topology: tpu7x:2x2x1
jax: 0.10.0
libtpu: 0.0.40
codegen_flags: <defaults>
</compile_context>

<pallas_src>
import numpy as np
import jax
import jax.numpy as jnp
from jax.experimental import pallas as pl
from jax.experimental.pallas import tpu as pltpu

_HEAD_W = 128     # lane-dense fused-head output width
_VAR_COL0 = 64    # var columns start here; mu lives in [0, q3)


def _elu(x):
    # torch.nn.ELU (alpha=1.0)
    return jnp.where(x > 0.0, x, jnp.exp(jnp.minimum(x, 0.0)) - 1.0)


def _softplus(x):
    # matches torch.nn.functional.softplus (beta=1, threshold=20)
    return jnp.where(x > 20.0, x, jnp.log(1.0 + jnp.exp(jnp.minimum(x, 20.0))))


def decoder7x7_kernel(x_ref, t1_ref, b1_ref, t2_ref, b2_ref, t3_ref, b3_ref,
                      th_ref, bh_ref, out_ref):
    f32 = jnp.float32
    bf16 = jnp.bfloat16
    x = x_ref[...].astype(bf16)
    h = _elu(jnp.dot(x, t1_ref[...], preferred_element_type=f32) + b1_ref[...])
    h = _elu(jnp.dot(h.astype(bf16), t2_ref[...], preferred_element_type=f32) + b2_ref[...])
    h = _elu(jnp.dot(h.astype(bf16), t3_ref[...], preferred_element_type=f32) + b3_ref[...])
    # Fused mu|var head: one lane-dense (TILE_N, 128) matmul + single store.
    y = jnp.dot(h.astype(bf16), th_ref[...], preferred_element_type=f32) + bh_ref[...]
    col = jax.lax.broadcasted_iota(jnp.int32, y.shape, 1)
    out_ref[...] = jnp.where(col >= _VAR_COL0, _softplus(y), y)


def _round_up(a, m):
    return (a + m - 1) // m * m


def decoder7x7_pallas(x_nchw, dp, *, tile_n=256):
    """x_nchw: (N, z_dim, Hin, Win) f32.  Returns (mu, var), each (N, 1, 7, 7)."""
    N = x_nchw.shape[0]
    feat = x_nchw.shape[1] * x_nchw.shape[2] * x_nchw.shape[3]
    k_in = dp['t1'].shape[0]
    q3 = dp['q3']
    hf, wf = dp['hw']

    # NCHW -> NHWC -> (N, feat); pad features to 128 lanes and the batch to a
    # multiple of the batch tile (tile is always a multiple of 8 sublanes).
    x2d = jnp.transpose(x_nchw, (0, 2, 3, 1)).reshape(N, feat).astype(jnp.float32)
    n_base = max(_round_up(N, 8), 8)
    tile = min(tile_n, n_base)
    n_pad = _round_up(n_base, tile)
    x2d_p = jnp.zeros((n_pad, k_in), jnp.float32).at[:N, :feat].set(x2d)

    operands = (x2d_p, dp['t1'], dp['b1'], dp['t2'], dp['b2'], dp['t3'],
                dp['b3'], dp['thead'], dp['bhead'])

    in_specs = [pl.BlockSpec((tile, k_in), lambda i: (i, 0))]
    in_specs += [pl.BlockSpec(op.shape, lambda i: (0, 0)) for op in operands[1:]]
    out_specs = pl.BlockSpec((tile, _HEAD_W), lambda i: (i, 0))

    d1, d2, d3, dh = dp['t1'].shape, dp['t2'].shape, dp['t3'].shape, dp['thead'].shape
    flops = 2 * n_pad * (d1[0] * d1[1] + d2[0] * d2[1] + d3[0] * d3[1] + dh[0] * dh[1])
    transcend = n_pad * (d1[1] + d2[1] + d3[1] + dh[1])
    bytes_accessed = int(sum(int(np.prod(op.shape)) * op.dtype.itemsize
                             for op in operands) + n_pad * _HEAD_W * 4)

    out2d = pl.pallas_call(
        decoder7x7_kernel,
        grid=(n_pad // tile,),
        in_specs=in_specs,
        out_specs=out_specs,
        out_shape=jax.ShapeDtypeStruct((n_pad, _HEAD_W), jnp.float32),
        compiler_params=pltpu.CompilerParams(dimension_semantics=("parallel",)),
        cost_estimate=pl.CostEstimate(flops=int(flops),
                                      transcendentals=int(transcend),
                                      bytes_accessed=bytes_accessed),
    )(*operands)

    mu = out2d[:N, :q3].reshape(N, hf, wf)[:, None, :, :]
    var = out2d[:N, _VAR_COL0:_VAR_COL0 + q3].reshape(N, hf, wf)[:, None, :, :]
    return mu, var


# ----------------------------- parameter glue ------------------------------ #

def build_dense_params(raw, hin=1, win=1, k_in_pad=128):
    """Bake ConvTranspose2d / 1x1 Conv2d weights into dense bf16 matrices."""

    def convT_dense(w, hin, win):
        # w: torch ConvTranspose2d weight layout (Cin, Cout, kH, kW)
        cin, cout, kh, kw = w.shape
        hout, wout = hin + kh - 1, win + kw - 1
        t = np.zeros((hin * win * cin, hout * wout * cout), np.float32)
        for i in range(hin):
            for j in range(win):
                p = i * win + j
                for ki in range(kh):
                    for kj in range(kw):
                        q = (i + ki) * wout + (j + kj)
                        t[p * cin:(p + 1) * cin, q * cout:(q + 1) * cout] += w[:, :, ki, kj]
        return t, hout, wout

    t1, h1, w1s = convT_dense(raw['w1'], hin, win)
    t2, h2, w2s = convT_dense(raw['w2'], h1, w1s)
    t3, h3, w3s = convT_dense(raw['w3'], h2, w2s)
    q3 = h3 * w3s
    cout3 = raw['w3'].shape[1]
    assert q3 <= _VAR_COL0 and _VAR_COL0 + q3 <= _HEAD_W

    # Pad the first layer's input-feature rows to 128 lanes (zero rows).
    t1p = np.zeros((k_in_pad, t1.shape[1]), np.float32)
    t1p[:t1.shape[0], :] = t1

    # Fused, lane-dense head: mu -> cols [0, q3), var -> cols [64, 64+q3).
    thead = np.zeros((q3 * cout3, _HEAD_W), np.float32)
    bhead = np.zeros((1, _HEAD_W), np.float32)
    for q in range(q3):
        thead[q * cout3:(q + 1) * cout3, q] = raw['wmu'][0, :, 0, 0]
        thead[q * cout3:(q + 1) * cout3, _VAR_COL0 + q] = raw['wvar'][0, :, 0, 0]
    bhead[0, :q3] = raw['bmu'][0]
    bhead[0, _VAR_COL0:_VAR_COL0 + q3] = raw['bvar'][0]

    bf16 = jnp.bfloat16
    return {
        't1': jnp.asarray(t1p, bf16),
        'b1': jnp.asarray(np.tile(raw['b1'], h1 * w1s)[None, :], jnp.float32),
        't2': jnp.asarray(t2, bf16),
        'b2': jnp.asarray(np.tile(raw['b2'], h2 * w2s)[None, :], jnp.float32),
        't3': jnp.asarray(t3, bf16),
        'b3': jnp.asarray(np.tile(raw['b3'], q3)[None, :], jnp.float32),
        'thead': jnp.asarray(thead, bf16),
        'bhead': jnp.asarray(bhead, jnp.float32),
        'q3': q3,
        'hw': (h3, w3s),
    }


# ------------------------------ numpy reference ---------------------------- #

def ref_forward(x, raw):
    x = np.asarray(x, np.float32)

    def convT(x, w, b):
        N, cin, H, W = x.shape
        cout = w.shape[1]
        out = np.zeros((N, cout, H + 2, W + 2), np.float32)
        for ki in range(3):
            for kj in range(3):
                out[:, :, ki:ki + H, kj:kj + W] += np.einsum('nchw,cd->ndhw', x, w[:, :, ki, kj])
        return out + b[None, :, None, None]

    def elu(v):
        return np.where(v > 0, v, np.expm1(v))

    h = elu(convT(x, raw['w1'], raw['b1']))
    h = elu(convT(h, raw['w2'], raw['b2']))
    h = elu(convT(h, raw['w3'], raw['b3']))
    mu = np.einsum('nchw,oc->nohw', h, raw['wmu'][:, :, 0, 0]) + raw['bmu'][None, :, None, None]
    pre = np.einsum('nchw,oc->nohw', h, raw['wvar'][:, :, 0, 0]) + raw['bvar'][None, :, None, None]
    var = np.where(pre > 20.0, pre, np.log1p(np.exp(np.minimum(pre, 20.0))))
    return mu, var


def _bf16_round(a):
    # Round weights to bf16-representable values (the deliberate quantization),
    # applied identically to the kernel parameters and the numpy reference.
    return np.asarray(jnp.asarray(a, jnp.bfloat16).astype(jnp.float32))


if __name__ == "__main__":
    z_dim, hidden_dim, N = 4, 16, 2
    key = jax.random.PRNGKey(0)
    ks = jax.random.split(key, 12)

    def nrm(k, shape, s):
        return np.asarray(jax.random.normal(k, shape, jnp.float32)) * s

    # Deterministic synthetic parameters (shapes follow the PyTorch __init__).
    raw = {
        'w1': nrm(ks[0], (z_dim, 2 * hidden_dim, 3, 3), 0.1),
        'b1': nrm(ks[1], (2 * hidden_dim,), 0.05),
        'w2': nrm(ks[2], (2 * hidden_dim, 2 * hidden_dim, 3, 3), 0.1),
        'b2': nrm(ks[3], (2 * hidden_dim,), 0.05),
        'w3': nrm(ks[4], (2 * hidden_dim, hidden_dim, 3, 3), 0.1),
        'b3': nrm(ks[5], (hidden_dim,), 0.05),
        'wmu': nrm(ks[6], (1, hidden_dim, 1, 1), 0.1),
        'bmu': nrm(ks[7], (1,), 0.05),
        'wvar': nrm(ks[8], (1, hidden_dim, 1, 1), 0.1),
        'bvar': nrm(ks[9], (1,), 0.05),
    }
    # Weights are stored/served in bf16; use the rounded values in the
    # reference as well so the comparison isolates kernel correctness.
    for k in ('w1', 'w2', 'w3', 'wmu', 'wvar'):
        raw[k] = _bf16_round(raw[k])

    dp = build_dense_params(raw, hin=1, win=1)

    # --- run 1: tiny batch (single grid step, exercises batch padding) -------
    x = jax.random.normal(ks[10], (N, z_dim, 1, 1), jnp.float32)  # NCHW, 1x1 spatial
    mu, var = decoder7x7_pallas(x, dp)
    mu, var = jax.block_until_ready((mu, var))
    mu_ref, var_ref = ref_forward(np.asarray(x), raw)
    assert mu.shape == (N, 1, 7, 7) and var.shape == (N, 1, 7, 7)
    np.testing.assert_allclose(np.asarray(mu), mu_ref, rtol=2e-2, atol=2e-2)
    np.testing.assert_allclose(np.asarray(var), var_ref, rtol=2e-2, atol=2e-2)

    # --- run 2: ragged batch with a multi-step "parallel" grid ---------------
    N2 = 19
    x2 = jax.random.normal(ks[11], (N2, z_dim, 1, 1), jnp.float32)
    mu2, var2 = decoder7x7_pallas(x2, dp, tile_n=8)
    mu2, var2 = jax.block_until_ready((mu2, var2))
    mu2_ref, var2_ref = ref_forward(np.asarray(x2), raw)
    assert mu2.shape == (N2, 1, 7, 7) and var2.shape == (N2, 1, 7, 7)
    np.testing.assert_allclose(np.asarray(mu2), mu2_ref, rtol=2e-2, atol=2e-2)
    np.testing.assert_allclose(np.asarray(var2), var2_ref, rtol=2e-2, atol=2e-2)

    print("KERNEL_OK")
</pallas_src>

<mosaic_0001>
module attributes {stable_mosaic.version = 11 : i64} {
  func.func @decoder7x7_kernel(%arg0: i32, %arg1: memref<8x128xf32, #tpu.memory_space<vmem>>, %arg2: memref<128x288xbf16, #tpu.memory_space<vmem>>, %arg3: memref<1x288xf32, #tpu.memory_space<vmem>>, %arg4: memref<288x800xbf16, #tpu.memory_space<vmem>>, %arg5: memref<1x800xf32, #tpu.memory_space<vmem>>, %arg6: memref<800x784xbf16, #tpu.memory_space<vmem>>, %arg7: memref<1x784xf32, #tpu.memory_space<vmem>>, %arg8: memref<784x128xbf16, #tpu.memory_space<vmem>>, %arg9: memref<1x128xf32, #tpu.memory_space<vmem>>, %arg10: memref<8x128xf32, #tpu.memory_space<vmem>>) attributes {dimension_semantics = [#tpu.dimension_semantics<parallel>], iteration_bounds = array<i64: 1>, scalar_prefetch = 0 : i64, scratch_operands = 0 : i64, tpu.core_type = #tpu.core_type<tc>, window_params = [{transform_indices = @transform_0, window_bounds = array<i64: 8, 128>}, {pipeline_mode = #tpu.pipeline_mode<synchronous>, transform_indices = @transform_1, window_bounds = array<i64: 128, 288>}, {pipeline_mode = #tpu.pipeline_mode<synchronous>, transform_indices = @transform_2, window_bounds = array<i64: 1, 288>}, {pipeline_mode = #tpu.pipeline_mode<synchronous>, transform_indices = @transform_3, window_bounds = array<i64: 288, 800>}, {pipeline_mode = #tpu.pipeline_mode<synchronous>, transform_indices = @transform_4, window_bounds = array<i64: 1, 800>}, {pipeline_mode = #tpu.pipeline_mode<synchronous>, transform_indices = @transform_5, window_bounds = array<i64: 800, 784>}, {pipeline_mode = #tpu.pipeline_mode<synchronous>, transform_indices = @transform_6, window_bounds = array<i64: 1, 784>}, {pipeline_mode = #tpu.pipeline_mode<synchronous>, transform_indices = @transform_7, window_bounds = array<i64: 784, 128>}, {pipeline_mode = #tpu.pipeline_mode<synchronous>, transform_indices = @transform_8, window_bounds = array<i64: 1, 128>}, {transform_indices = @transform_9, window_bounds = array<i64: 8, 128>}]} {
    %c0 = arith.constant 0 : index
    %c0_0 = arith.constant 0 : index
    %0 = vector.load %arg1[%c0, %c0_0] : memref<8x128xf32, #tpu.memory_space<vmem>>, vector<8x128xf32>
    %1 = arith.truncf %0 : vector<8x128xf32> to vector<8x128xbf16>
    %c0_1 = arith.constant 0 : index
    %c0_2 = arith.constant 0 : index
    %2 = vector.load %arg2[%c0_1, %c0_2] : memref<128x288xbf16, #tpu.memory_space<vmem>>, vector<128x288xbf16>
    %cst = arith.constant dense<0.000000e+00> : vector<8x288xf32>
    %3 = tpu.matmul %1, %2, %cst {dimension_numbers = #tpu.dot_dimension_numbers<[1], [0], [0], [1], [0, 0, 1, 1], [], []>} : vector<8x128xbf16>, vector<128x288xbf16>, vector<8x288xf32> -> vector<8x288xf32>
    %c0_3 = arith.constant 0 : index
    %c0_4 = arith.constant 0 : index
    %4 = vector.load %arg3[%c0_3, %c0_4] : memref<1x288xf32, #tpu.memory_space<vmem>>, vector<1x288xf32>
    %5 = vector.broadcast %4 : vector<1x288xf32> to vector<8x288xf32>
    %6 = arith.addf %3, %5 : vector<8x288xf32>
    %cst_5 = arith.constant 0.000000e+00 : f32
    %7 = vector.broadcast %cst_5 : f32 to vector<8x288xf32>
    %8 = arith.cmpf ogt, %6, %7 : vector<8x288xf32>
    %cst_6 = arith.constant 0.000000e+00 : f32
    %9 = vector.broadcast %cst_6 : f32 to vector<8x288xf32>
    %10 = arith.minimumf %6, %9 : vector<8x288xf32>
    %11 = math.exp %10 : vector<8x288xf32>
    %cst_7 = arith.constant 1.000000e+00 : f32
    %12 = vector.broadcast %cst_7 : f32 to vector<8x288xf32>
    %13 = arith.subf %11, %12 : vector<8x288xf32>
    %14 = arith.select %8, %6, %13 : vector<8x288xi1>, vector<8x288xf32>
    %15 = arith.truncf %14 : vector<8x288xf32> to vector<8x288xbf16>
    %c0_8 = arith.constant 0 : index
    %c0_9 = arith.constant 0 : index
    %16 = vector.load %arg4[%c0_8, %c0_9] : memref<288x800xbf16, #tpu.memory_space<vmem>>, vector<288x800xbf16>
    %cst_10 = arith.constant dense<0.000000e+00> : vector<8x800xf32>
    %17 = tpu.matmul %15, %16, %cst_10 {dimension_numbers = #tpu.dot_dimension_numbers<[1], [0], [0], [1], [0, 0, 1, 1], [], []>} : vector<8x288xbf16>, vector<288x800xbf16>, vector<8x800xf32> -> vector<8x800xf32>
    %c0_11 = arith.constant 0 : index
    %c0_12 = arith.constant 0 : index
    %18 = vector.load %arg5[%c0_11, %c0_12] : memref<1x800xf32, #tpu.memory_space<vmem>>, vector<1x800xf32>
    %19 = vector.broadcast %18 : vector<1x800xf32> to vector<8x800xf32>
    %20 = arith.addf %17, %19 : vector<8x800xf32>
    %cst_13 = arith.constant 0.000000e+00 : f32
    %21 = vector.broadcast %cst_13 : f32 to vector<8x800xf32>
    %22 = arith.cmpf ogt, %20, %21 : vector<8x800xf32>
    %cst_14 = arith.constant 0.000000e+00 : f32
    %23 = vector.broadcast %cst_14 : f32 to vector<8x800xf32>
    %24 = arith.minimumf %20, %23 : vector<8x800xf32>
    %25 = math.exp %24 : vector<8x800xf32>
    %cst_15 = arith.constant 1.000000e+00 : f32
    %26 = vector.broadcast %cst_15 : f32 to vector<8x800xf32>
    %27 = arith.subf %25, %26 : vector<8x800xf32>
    %28 = arith.select %22, %20, %27 : vector<8x800xi1>, vector<8x800xf32>
    %29 = arith.truncf %28 : vector<8x800xf32> to vector<8x800xbf16>
    %c0_16 = arith.constant 0 : index
    %c0_17 = arith.constant 0 : index
    %30 = vector.load %arg6[%c0_16, %c0_17] : memref<800x784xbf16, #tpu.memory_space<vmem>>, vector<800x784xbf16>
    %cst_18 = arith.constant dense<0.000000e+00> : vector<8x784xf32>
    %31 = tpu.matmul %29, %30, %cst_18 {dimension_numbers = #tpu.dot_dimension_numbers<[1], [0], [0], [1], [0, 0, 1, 1], [], []>} : vector<8x800xbf16>, vector<800x784xbf16>, vector<8x784xf32> -> vector<8x784xf32>
    %c0_19 = arith.constant 0 : index
    %c0_20 = arith.constant 0 : index
    %32 = vector.load %arg7[%c0_19, %c0_20] : memref<1x784xf32, #tpu.memory_space<vmem>>, vector<1x784xf32>
    %33 = vector.broadcast %32 : vector<1x784xf32> to vector<8x784xf32>
    %34 = arith.addf %31, %33 : vector<8x784xf32>
    %cst_21 = arith.constant 0.000000e+00 : f32
    %35 = vector.broadcast %cst_21 : f32 to vector<8x784xf32>
    %36 = arith.cmpf ogt, %34, %35 : vector<8x784xf32>
    %cst_22 = arith.constant 0.000000e+00 : f32
    %37 = vector.broadcast %cst_22 : f32 to vector<8x784xf32>
    %38 = arith.minimumf %34, %37 : vector<8x784xf32>
    %39 = math.exp %38 : vector<8x784xf32>
    %cst_23 = arith.constant 1.000000e+00 : f32
    %40 = vector.broadcast %cst_23 : f32 to vector<8x784xf32>
    %41 = arith.subf %39, %40 : vector<8x784xf32>
    %42 = arith.select %36, %34, %41 : vector<8x784xi1>, vector<8x784xf32>
    %43 = arith.truncf %42 : vector<8x784xf32> to vector<8x784xbf16>
    %c0_24 = arith.constant 0 : index
    %c0_25 = arith.constant 0 : index
    %44 = vector.load %arg8[%c0_24, %c0_25] : memref<784x128xbf16, #tpu.memory_space<vmem>>, vector<784x128xbf16>
    %cst_26 = arith.constant dense<0.000000e+00> : vector<8x128xf32>
    %45 = tpu.matmul %43, %44, %cst_26 {dimension_numbers = #tpu.dot_dimension_numbers<[1], [0], [0], [1], [0, 0, 1, 1], [], []>} : vector<8x784xbf16>, vector<784x128xbf16>, vector<8x128xf32> -> vector<8x128xf32>
    %c0_27 = arith.constant 0 : index
    %c0_28 = arith.constant 0 : index
    %46 = vector.load %arg9[%c0_27, %c0_28] : memref<1x128xf32, #tpu.memory_space<vmem>>, vector<1x128xf32>
    %47 = vector.broadcast %46 : vector<1x128xf32> to vector<8x128xf32>
    %48 = arith.addf %45, %47 : vector<8x128xf32>
    %49 = tpu.iota {dimensions = array<i32: 1>} : vector<8x128xi32>
    %c64_i32 = arith.constant 64 : i32
    %50 = vector.broadcast %c64_i32 : i32 to vector<8x128xi32>
    %51 = arith.cmpi sge, %49, %50 : vector<8x128xi32>
    %cst_29 = arith.constant 2.000000e+01 : f32
    %52 = vector.broadcast %cst_29 : f32 to vector<8x128xf32>
    %53 = arith.cmpf ogt, %48, %52 : vector<8x128xf32>
    %cst_30 = arith.constant 2.000000e+01 : f32
    %54 = vector.broadcast %cst_30 : f32 to vector<8x128xf32>
    %55 = arith.minimumf %48, %54 : vector<8x128xf32>
    %56 = math.exp %55 : vector<8x128xf32>
    %cst_31 = arith.constant 1.000000e+00 : f32
    %57 = vector.broadcast %cst_31 : f32 to vector<8x128xf32>
    %58 = arith.addf %57, %56 : vector<8x128xf32>
    %59 = math.log %58 : vector<8x128xf32>
    %60 = arith.select %53, %48, %59 : vector<8x128xi1>, vector<8x128xf32>
    %61 = arith.select %51, %60, %48 : vector<8x128xi1>, vector<8x128xf32>
    %c0_32 = arith.constant 0 : index
    %c0_33 = arith.constant 0 : index
    %62 = vector.load %arg10[%c0_32, %c0_33] : memref<8x128xf32, #tpu.memory_space<vmem>>, vector<8x128xf32>
    tpu.vector_store %arg10[%c0_32, %c0_33], %61 {strides = array<i32>} : memref<8x128xf32, #tpu.memory_space<vmem>>, vector<8x128xf32>,
    return
  }
  func.func @transform_0(%arg0: i32) -> (i32, i32) {
    %c0_i32 = arith.constant 0 : i32
    %c0_i32_0 = arith.constant 0 : i32
    return %arg0, %c0_i32 : i32, i32
  }
  func.func @transform_1(%arg0: i32) -> (i32, i32) {
    %c0_i32 = arith.constant 0 : i32
    %c0_i32_0 = arith.constant 0 : i32
    %c0_i32_1 = arith.constant 0 : i32
    return %c0_i32, %c0_i32_0 : i32, i32
  }
  func.func @transform_2(%arg0: i32) -> (i32, i32) {
    %c0_i32 = arith.constant 0 : i32
    %c0_i32_0 = arith.constant 0 : i32
    %c0_i32_1 = arith.constant 0 : i32
    return %c0_i32, %c0_i32_0 : i32, i32
  }
  func.func @transform_3(%arg0: i32) -> (i32, i32) {
    %c0_i32 = arith.constant 0 : i32
    %c0_i32_0 = arith.constant 0 : i32
    %c0_i32_1 = arith.constant 0 : i32
    return %c0_i32, %c0_i32_0 : i32, i32
  }
  func.func @transform_4(%arg0: i32) -> (i32, i32) {
    %c0_i32 = arith.constant 0 : i32
    %c0_i32_0 = arith.constant 0 : i32
    %c0_i32_1 = arith.constant 0 : i32
    return %c0_i32, %c0_i32_0 : i32, i32
  }
  func.func @transform_5(%arg0: i32) -> (i32, i32) {
    %c0_i32 = arith.constant 0 : i32
    %c0_i32_0 = arith.constant 0 : i32
    %c0_i32_1 = arith.constant 0 : i32
    return %c0_i32, %c0_i32_0 : i32, i32
  }
  func.func @transform_6(%arg0: i32) -> (i32, i32) {
    %c0_i32 = arith.constant 0 : i32
    %c0_i32_0 = arith.constant 0 : i32
    %c0_i32_1 = arith.constant 0 : i32
    return %c0_i32, %c0_i32_0 : i32, i32
  }
  func.func @transform_7(%arg0: i32) -> (i32, i32) {
    %c0_i32 = arith.constant 0 : i32
    %c0_i32_0 = arith.constant 0 : i32
    %c0_i32_1 = arith.constant 0 : i32
    return %c0_i32, %c0_i32_0 : i32, i32
  }
  func.func @transform_8(%arg0: i32) -> (i32, i32) {
    %c0_i32 = arith.constant 0 : i32
    %c0_i32_0 = arith.constant 0 : i32
    %c0_i32_1 = arith.constant 0 : i32
    return %c0_i32, %c0_i32_0 : i32, i32
  }
  func.func @transform_9(%arg0: i32) -> (i32, i32) {
    %c0_i32 = arith.constant 0 : i32
    %c0_i32_0 = arith.constant 0 : i32
    return %arg0, %c0_i32 : i32, i32
  }
}

</mosaic_0001>

<bundles_post_ra>
// kernel: tpu_custom_call.1
= control target key start
LH: loop header
LB: loop body
LE: loop exit
PB: predicated region body
PF: predicated region fallthrough
CT: control target
= control target key end

     0   :  { %v6728_v1 = vmov 0.0   ;;  %vm6729_vm0 = vmmov 0   ;;  %v6730_v5 = vmov 0   ;;  %vm1144_vm3 = vcmask 261120   ;;  %s8625_s0 = inlined_call_operand.vmem [shape: f32[8,128], index: 0, kind: input, shape index: {}]   ;;  %s8626_s1 = inlined_call_operand.vmem [shape: bf16[128,288], index: 1, kind: input, shape index: {}]   ;;  %s8627_s2 = inlined_call_operand.vmem [shape: f32[1,288], index: 2, kind: input, shape index: {}]   ;;  %s8628_s3 = inlined_call_operand.vmem [shape: bf16[288,800], index: 3, kind: input, shape index: {}]   ;;  %s8629_s4 = inlined_call_operand.vmem [shape: f32[1,800], index: 4, kind: input, shape index: {}]   ;;  %s8630_s5 = inlined_call_operand.vmem [shape: bf16[800,784], index: 5, kind: input, shape index: {}]   ;;  %s8631_s6 = inlined_call_operand.vmem [shape: f32[1,784], index: 6, kind: input, shape index: {}]   ;;  %s8632_s7 = inlined_call_operand.vmem [shape: bf16[784,128], index: 7, kind: input, shape index: {}]   ;;  %s8633_s8 = inlined_call_operand.vmem [shape: f32[1,128], index: 8, kind: input, shape index: {}]   ;;  %s8634_s9 = inlined_call_operand.hbm [shape: f32[8,128], index: 9, kind: output, shape index: {}]  }
   0x1   :  { %v5905_v0 = vld [vmem:[%s8626_s1 + $0x4] ss:$12 sps:$4 sm:$0xff]   ;;  %5801 = vmatprep.subr.bf16.mxu1 %v6728_v1  ;;  %v5907_v2 = vld [vmem:[%s8626_s1 + $0x8] ss:$12 sps:$4 sm:$0xff]   ;;  %5817 = vmatprep.mubr.msk.bf16.mxu1 %vm6729_vm0, %v6728_v1  ;;  %v5908_v3 = vld [vmem:[%s8626_s1] ss:$12 sps:$4 sm:$0xff]  }
   0x2   :  { %213 = vmatprep.subr.bf16.mxu0 %v5905_v0  ;;  %5802 = vmatpush3.bf16.msra.mxu1 %v5907_v2  ;;  %v5909_v4 = vld [vmem:[%s8626_s1 + $0x1c] ss:$12 sps:$4 sm:$0xff]   ;;  %v5911_v6 = vld [vmem:[%s8626_s1 + $0x20] ss:$12 sps:$4 sm:$0xff]   ;;  %v5912_v7 = vld [vmem:[%s8626_s1 + $0x18] ss:$12 sps:$4 sm:$0xff]  }
   0x3   :  { %245 = vmatprep.mubr.bf16.mxu0 %v6730_v5  ;;  %214 = vmatpush1.bf16.msra.mxu0 %v5908_v3  ;;  %v5913_v8 = vld [vmem:[%s8626_s1 + $0x34] ss:$12 sps:$4 sm:$0xff]   ;;  %v5915_v9 = vld [vmem:[%s8626_s1 + $0x38] ss:$12 sps:$4 sm:$0xff]   ;;  %v5916_v10 = vld [vmem:[%s8626_s1 + $0x30] ss:$12 sps:$4 sm:$0xff]   ;;  %v70_v3 = vlaneseq }
   0x4   :  { %5803 = vmatprep.subr.bf16.mxu1 %v6728_v1  ;;  %215 = vmatprep.subr.bf16.mxu0 %v5909_v4  ;;  %v5917_v11 = vld [vmem:[%s8626_s1 + $0x4c] ss:$12 sps:$4 sm:$0xff]   ;;  %v5919_v12 = vld [vmem:[%s8626_s1 + $0x50] ss:$12 sps:$4 sm:$0xff]   ;;  %v5920_v13 = vld [vmem:[%s8626_s1 + $0x48] ss:$12 sps:$4 sm:$0xff]  }
   0x5   :  { %v5921_v14 = vld [vmem:[%s8626_s1 + $0x64] ss:$12 sps:$4 sm:$0xff]   ;;  %v5923_v15 = vld [vmem:[%s8626_s1 + $0x68] ss:$12 sps:$4 sm:$0xff]   ;;  %v5924_v16 = vld [vmem:[%s8626_s1 + $0x60] ss:$12 sps:$4 sm:$0xff]  }
   0x6   :  { %5804 = vmatpush3.bf16.msra.mxu1 %v5911_v6  ;;  %v5925_v17 = vld [vmem:[%s8626_s1 + $0x7c] ss:$12 sps:$4 sm:$0xff]   ;;  %v5927_v18 = vld [vmem:[%s8626_s1 + $0x80] ss:$12 sps:$4 sm:$0xff]   ;;  %v5928_v19 = vld [vmem:[%s8626_s1 + $0x78] ss:$12 sps:$4 sm:$0xff]  }
   0x7   :  { %216 = vmatpush1.bf16.msra.mxu0 %v5912_v7  ;;  %5805 = vmatprep.subr.bf16.mxu1 %v6728_v1  ;;  %v5929_v20 = vld [vmem:[%s8626_s1 + $0x94] ss:$12 sps:$4 sm:$0xff]   ;;  %v5931_v21 = vld [vmem:[%s8626_s1 + $0x98] ss:$12 sps:$4 sm:$0xff]   ;;  %v5932_v22 = vld [vmem:[%s8626_s1 + $0x90] ss:$12 sps:$4 sm:$0xff]  }
   0x8   :  { %217 = vmatprep.subr.bf16.mxu0 %v5913_v8  ;;  %v5933_v23 = vld [vmem:[%s8626_s1 + $0xac] ss:$12 sps:$4 sm:$0xff]   ;;  %v5935_v24 = vld [vmem:[%s8626_s1 + $0xb0] ss:$12 sps:$4 sm:$0xff]   ;;  %v34_v25 = vld [vmem:[%s8625_s0] sm:$0xff]  ;;  %v6984_v4 = vshrl.u32 %v70_v3, 7 }
   0x9   :  { %v5936_v26 = vld [vmem:[%s8626_s1 + $0xa8] ss:$12 sps:$4 sm:$0xff]   ;;  %v5939_v27 = vld [vmem:[%s8628_s3 + $0x4] ss:$28 sps:$4 sm:$0xff]   ;;  %v35_v28 = vpack.c.bf16 %v34_v25, %v34_v25  ;;  %v5942_v30 = vld [vmem:[%s8628_s3 + $0x3c] ss:$28 sps:$4 sm:$0xff]  }
   0xa   :  { %5806 = vmatpush3.bf16.msra.mxu1 %v5915_v9  ;;  %v5937_v29 = vld [vmem:[%s8628_s3] ss:$28 sps:$4 sm:$0xff]   ;;  %v5940_v31 = vld [vmem:[%s8628_s3 + $0x38] ss:$28 sps:$4 sm:$0xff]   ;;  %v5943_v33 = vld [vmem:[%s8628_s3 + $0x70] ss:$28 sps:$4 sm:$0xff]  }
   0xb   :  { %218 = vmatpush1.bf16.msra.mxu0 %v5916_v10  ;;  %5807 = vmatprep.subr.bf16.mxu1 %v6728_v1  ;;  %v5945_v32 = vld [vmem:[%s8628_s3 + $0x74] ss:$28 sps:$4 sm:$0xff]   ;;  %v5948_v34 = vld [vmem:[%s8628_s3 + $0xac] ss:$28 sps:$4 sm:$0xff]   ;;  %v5951_v36 = vld [vmem:[%s8628_s3 + $0xe4] ss:$28 sps:$4 sm:$0xff]  }
   0xc   :  { %219 = vmatprep.subr.bf16.mxu0 %v5917_v11  ;;  %v5946_v35 = vld [vmem:[%s8628_s3 + $0xa8] ss:$28 sps:$4 sm:$0xff]   ;;  %v5949_v37 = vld [vmem:[%s8628_s3 + $0xe0] ss:$28 sps:$4 sm:$0xff]   ;;  %v5952_v39 = vld [vmem:[%s8628_s3 + $0x118] ss:$28 sps:$4 sm:$0xff]  }
   0xd   :  { %v5954_v38 = vld [vmem:[%s8628_s3 + $0x11c] ss:$28 sps:$4 sm:$0xff]   ;;  %v5957_v40 = vld [vmem:[%s8628_s3 + $0x154] ss:$28 sps:$4 sm:$0xff]   ;;  %v5960_v42 = vld [vmem:[%s8628_s3 + $0x18c] ss:$28 sps:$4 sm:$0xff]  }
   0xe   :  { %5808 = vmatpush3.bf16.msra.mxu1 %v5919_v12  ;;  %v5955_v41 = vld [vmem:[%s8628_s3 + $0x150] ss:$28 sps:$4 sm:$0xff]   ;;  %v5958_v43 = vld [vmem:[%s8628_s3 + $0x188] ss:$28 sps:$4 sm:$0xff]   ;;  %v5961_v45 = vld [vmem:[%s8628_s3 + $0x1c0] ss:$28 sps:$4 sm:$0xff]  }
   0xf   :  { %220 = vmatpush1.bf16.msra.mxu0 %v5920_v13  ;;  %5809 = vmatprep.subr.bf16.mxu1 %v6728_v1  ;;  %v5963_v44 = vld [vmem:[%s8628_s3 + $0x1c4] ss:$28 sps:$4 sm:$0xff]   ;;  %v5966_v46 = vld [vmem:[%s8628_s3 + $0x1fc] ss:$28 sps:$4 sm:$0xff]   ;;  %v5969_v48 = vld [vmem:[%s8628_s3 + $0x234] ss:$28 sps:$4 sm:$0xff]  }
  0x10   :  { %221 = vmatprep.subr.bf16.mxu0 %v5921_v14  ;;  %v5964_v47 = vld [vmem:[%s8628_s3 + $0x1f8] ss:$28 sps:$4 sm:$0xff]   ;;  %v5967_v49 = vld [vmem:[%s8628_s3 + $0x230] ss:$28 sps:$4 sm:$0xff]   ;;  %v5970_v51 = vld [vmem:[%s8628_s3 + $0x268] ss:$28 sps:$4 sm:$0xff]  }
  0x11   :  { %v5972_v50 = vld [vmem:[%s8628_s3 + $0x26c] ss:$28 sps:$4 sm:$0xff]   ;;  %v5975_v52 = vld [vmem:[%s8628_s3 + $0x2a4] ss:$28 sps:$4 sm:$0xff]   ;;  %v5978_v54 = vld [vmem:[%s8628_s3 + $0x2dc] ss:$28 sps:$4 sm:$0xff]  }
  0x12   :  { %5810 = vmatpush3.bf16.msra.mxu1 %v5923_v15  ;;  %v5973_v53 = vld [vmem:[%s8628_s3 + $0x2a0] ss:$28 sps:$4 sm:$0xff]   ;;  %v5976_v55 = vld [vmem:[%s8628_s3 + $0x2d8] ss:$28 sps:$4 sm:$0xff]   ;;  %v5982_v59 = vld [vmem:[%s8628_s3 + $0x310] ss:$28 sps:$4 sm:$0xff]  }
  0x13   :  { %222 = vmatpush1.bf16.msra.mxu0 %v5924_v16  ;;  %5811 = vmatprep.subr.bf16.mxu1 %v6728_v1  ;;  %v5981_v56 = vld [vmem:[%s8628_s3 + $0x384] ss:$28 sps:$4 sm:$0xff]   ;;  %v5984_v58 = vld [vmem:[%s8628_s3 + $0x314] ss:$28 sps:$4 sm:$0xff]   ;;  %v5987_v60 = vld [vmem:[%s8628_s3 + $0x3bc] ss:$28 sps:$4 sm:$0xff]  }
  0x14   :  { %223 = vmatprep.subr.bf16.mxu0 %v5925_v17  ;;  %v5979_v57 = vld [vmem:[%s8628_s3 + $0x380] ss:$28 sps:$4 sm:$0xff]   ;;  %v5985_v61 = vld [vmem:[%s8628_s3 + $0x3b8] ss:$28 sps:$4 sm:$0xff]   ;;  %v5990_v62 = vld [vmem:[%s8628_s3 + $0x34c] ss:$28 sps:$4 sm:$0xff]  }
  0x15   :  { %v5988_v63 = vld [vmem:[%s8628_s3 + $0x348] ss:$28 sps:$4 sm:$0xff]   ;;  %v5996_v2 = vld [vmem:[%s8628_s3 + $0x14] ss:$28 sps:$4 sm:$0xff]   ;;  %v68_v6 = vld [vmem:[%s8627_s2] sm:$0x7] }
  0x16   :  { %5812 = vmatpush3.bf16.msra.mxu1 %v5927_v18  ;;  %v5993_v0 = vld [vmem:[%s8628_s3 + $0xc] ss:$28 sps:$4 sm:$0xff]   ;;  %v6990_v7 = vsub.s32 2, %v6984_v4  ;;  %v6993_v8 = vsub.s32 0, %v6984_v4  ;;  %v6996_v9 = vsub.s32 1, %v6984_v4 }
  0x17   :  { %224 = vmatpush1.bf16.msra.mxu0 %v5928_v19  ;;  %5813 = vmatprep.subr.bf16.mxu1 %v6728_v1 }
  0x18   :  { %225 = vmatprep.subr.bf16.mxu0 %v5929_v20  ;;  %v81_v10 = vrot.slane %v68_v6, %v6990_v7  ;;  %v73_v11 = vrot.slane %v68_v6, %v6993_v8  ;;  %v77_v12 = vrot.slane %v68_v6, %v6996_v9  ;;  %v6032_v6 = vld [vmem:[%s8628_s3 + $0x164] ss:$28 sps:$4 sm:$0xff]  }
  0x1a   :  { %5814 = vmatpush3.bf16.msra.mxu1 %v5931_v21 }
  0x1b   :  { %226 = vmatpush1.bf16.msra.mxu0 %v5932_v22  ;;  %5815 = vmatprep.subr.bf16.mxu1 %v6728_v1 }
  0x1c   :  { %227 = vmatprep.subr.bf16.mxu0 %v5933_v23 }
  0x1e   :  { %5816 = vmatpush3.bf16.msra.mxu1 %v5935_v24 }
  0x1f   :  { %228 = vmatpush1.bf16.msra.mxu0 %v5936_v26  ;;  %1189 = vmatprep.subr.bf16.mxu1 %v5981_v56  ;;  %v6017_v56 = vld [vmem:[%s8628_s3 + $0xec] ss:$28 sps:$4 sm:$0xff]  }
  0x20   :  { %1148 = vmatprep.subr.bf16.mxu0 %v5939_v27 }
  0x21   :  { %5818 = vmatmul.mubr.bf16.vlgmr.msra.gmra.mrb[0].mxu1 %v35_v28 }
  0x22   :  { %246 = vmatmul.mubr.bf16.vlgmr.msra.gmra.mrb[0].mxu0 %v35_v28  ;;  %1221 = vmatprep.mubr.bf16.mxu1 %v6730_v5 }
  0x23   :  { %1149 = vmatpush1.bf16.msra.mxu0 %v5937_v29  ;;  %1190 = vmatpush1.bf16.msra.mxu1 %v5979_v57  ;;  %v6015_v57 = vld [vmem:[%s8628_s3 + $0xe8] ss:$28 sps:$4 sm:$0xff]  }
  0x24   :  { %1150 = vmatprep.subr.bf16.mxu0 %v5942_v30  ;;  %1191 = vmatprep.subr.bf16.mxu1 %v5987_v60  ;;  %v6023_v60 = vld [vmem:[%s8628_s3 + $0x124] ss:$28 sps:$4 sm:$0xff]  }
  0x27   :  { %1151 = vmatpush1.bf16.msra.mxu0 %v5940_v31  ;;  %1192 = vmatpush1.bf16.msra.mxu1 %v5985_v61  ;;  %v6021_v61 = vld [vmem:[%s8628_s3 + $0x120] ss:$28 sps:$4 sm:$0xff]  }
  0x28   :  { %1152 = vmatprep.subr.bf16.mxu0 %v5945_v32  ;;  %1230 = vmatprep.subr.bf16.mxu1 %v5993_v0  ;;  %v6029_v0 = vld [vmem:[%s8628_s3 + $0x15c] ss:$28 sps:$4 sm:$0xff]  }
  0x2b   :  { %1153 = vmatpush1.bf16.msra.mxu0 %v5943_v33 }
  0x2c   :  { %1154 = vmatprep.subr.bf16.mxu0 %v5948_v34 }
  0x2f   :  { %1155 = vmatpush1.bf16.msra.mxu0 %v5946_v35 }
  0x30   :  { %1156 = vmatprep.subr.bf16.mxu0 %v5951_v36 }
  0x33   :  { %1157 = vmatpush1.bf16.msra.mxu0 %v5949_v37  ;;  %v5991_v37 = vld [vmem:[%s8628_s3 + $0x8] ss:$28 sps:$4 sm:$0xff]  }
  0x34   :  { %1158 = vmatprep.subr.bf16.mxu0 %v5954_v38 }
  0x37   :  { %1159 = vmatpush1.bf16.msra.mxu0 %v5952_v39 }
  0x38   :  { %1160 = vmatprep.subr.bf16.mxu0 %v5957_v40  ;;  %v5994_v40 = vld [vmem:[%s8628_s3 + $0x10] ss:$28 sps:$4 sm:$0xff]  }
  0x3b   :  { %1161 = vmatpush1.bf16.msra.mxu0 %v5955_v41  ;;  %v5999_v41 = vld [vmem:[%s8628_s3 + $0x44] ss:$28 sps:$4 sm:$0xff]  }
  0x3c   :  { %1162 = vmatprep.subr.bf16.mxu0 %v5960_v42 }
  0x3f   :  { %1163 = vmatpush1.bf16.msra.mxu0 %v5958_v43 }
  0x40   :  { %1164 = vmatprep.subr.bf16.mxu0 %v5963_v44 }
  0x43   :  { %1165 = vmatpush1.bf16.msra.mxu0 %v5961_v45  ;;  %v5997_v45 = vld [vmem:[%s8628_s3 + $0x40] ss:$28 sps:$4 sm:$0xff]  }
  0x44   :  { %1166 = vmatprep.subr.bf16.mxu0 %v5966_v46  ;;  %v6002_v46 = vld [vmem:[%s8628_s3 + $0x4c] ss:$28 sps:$4 sm:$0xff]  }
  0x47   :  { %1167 = vmatpush1.bf16.msra.mxu0 %v5964_v47  ;;  %v6000_v47 = vld [vmem:[%s8628_s3 + $0x48] ss:$28 sps:$4 sm:$0xff]  }
  0x48   :  { %1168 = vmatprep.subr.bf16.mxu0 %v5969_v48  ;;  %v6005_v48 = vld [vmem:[%s8628_s3 + $0x7c] ss:$28 sps:$4 sm:$0xff]  }
  0x4b   :  { %1169 = vmatpush1.bf16.msra.mxu0 %v5967_v49  ;;  %v6003_v49 = vld [vmem:[%s8628_s3 + $0x78] ss:$28 sps:$4 sm:$0xff]  }
  0x4c   :  { %1170 = vmatprep.subr.bf16.mxu0 %v5972_v50  ;;  %v6008_v50 = vld [vmem:[%s8628_s3 + $0x84] ss:$28 sps:$4 sm:$0xff]  }
  0x4f   :  { %1171 = vmatpush1.bf16.msra.mxu0 %v5970_v51  ;;  %v6006_v51 = vld [vmem:[%s8628_s3 + $0x80] ss:$28 sps:$4 sm:$0xff]  }
  0x50   :  { %1172 = vmatprep.subr.bf16.mxu0 %v5975_v52  ;;  %v6011_v52 = vld [vmem:[%s8628_s3 + $0xb4] ss:$28 sps:$4 sm:$0xff]  }
  0x53   :  { %1173 = vmatpush1.bf16.msra.mxu0 %v5973_v53  ;;  %v6009_v53 = vld [vmem:[%s8628_s3 + $0xb0] ss:$28 sps:$4 sm:$0xff]  }
  0x54   :  { %1174 = vmatprep.subr.bf16.mxu0 %v5978_v54  ;;  %v6014_v54 = vld [vmem:[%s8628_s3 + $0xbc] ss:$28 sps:$4 sm:$0xff]  }
  0x57   :  { %1175 = vmatpush1.bf16.msra.mxu0 %v5976_v55  ;;  %v6012_v55 = vld [vmem:[%s8628_s3 + $0xb8] ss:$28 sps:$4 sm:$0xff]  }
  0x58   :  { %1176 = vmatprep.subr.bf16.mxu0 %v5984_v58  ;;  %v6020_v58 = vld [vmem:[%s8628_s3 + $0xf4] ss:$28 sps:$4 sm:$0xff]  }
  0x5b   :  { %1177 = vmatpush1.bf16.msra.mxu0 %v5982_v59  ;;  %v6018_v59 = vld [vmem:[%s8628_s3 + $0xf0] ss:$28 sps:$4 sm:$0xff]  }
  0x5c   :  { %1178 = vmatprep.subr.bf16.mxu0 %v5990_v62  ;;  %v6026_v62 = vld [vmem:[%s8628_s3 + $0x12c] ss:$28 sps:$4 sm:$0xff]  }
  0x5f   :  { %1179 = vmatpush1.bf16.msra.mxu0 %v5988_v63  ;;  %v6024_v63 = vld [vmem:[%s8628_s3 + $0x128] ss:$28 sps:$4 sm:$0xff]  }
  0x60   :  { %1312 = vmatprep.subr.bf16.mxu0 %v5996_v2  ;;  %v6027_v2 = vld [vmem:[%s8628_s3 + $0x158] ss:$28 sps:$4 sm:$0xff]  }
  0xf4   :  { %v288_v13 = vpop.f32.mrb[0].mxu1 }
  0xf5   :  { %v289_v14 = vadd.f32 %v288_v13, %v81_v10  ;;  %v247_v15 = vpop.f32.mrb[0].mxu0  ;;  %v5819_v16 = vpop.f32.mrb[1].mxu1  ;;  %v6035_v10 = vld [vmem:[%s8628_s3 + $0x194] ss:$28 sps:$4 sm:$0xff]  }
  0xf6   :  { %v248_v17 = vadd.f32 %v247_v15, %v73_v11  ;;  %v249_v18 = vpop.f32.mrb[1].mxu0  ;;  %v291_v19 = vpop.f32.mrb[2].mxu1  ;;  %v6030_v11 = vld [vmem:[%s8628_s3 + $0x160] ss:$28 sps:$4 sm:$0xff]  }
  0xf7   :  { %v299_v20 = vmin.f32 %v289_v14, 0.0  ;;  %v250_v21 = vadd.f32 %v249_v18, %v77_v12  ;;  %v5820_v22 = vpop.f32.mrb[3].mxu1  ;;  %v251_v23 = vpop.f32.mrb[2].mxu0  ;;  %vm296_vm1 = vcmp.gt.f32.partialorder %v289_v14, 0.0 }
  0xf8   :  { %v297_v24 = vmin.f32 %v248_v17, 0.0  ;;  %v252_v25 = vpop.f32.mrb[3].mxu0  ;;  %vm294_vm2 = vcmp.gt.f32.partialorder %v248_v17, 0.0 }
  0xf9   :  { %v304_v26 = vmul.f32 1.442695, %v299_v20  ;;  %v298_v27 = vmin.f32 %v250_v21, 0.0  ;;  %vm295_vm4 = vcmp.gt.f32.partialorder %v250_v21, 0.0 }
  0xfa   :  { %v300_v28 = vmul.f32 1.442695, %v297_v24 }
  0xfb   :  { %6666 = vpow2.f32 %v304_v26  ;;  %v302_v29 = vmul.f32 1.442695, %v298_v27 }
  0xfc   :  { %6668 = vpow2.f32 %v300_v28 }
  0xfd   :  { %6670 = vpow2.f32 %v302_v29 }
 0x105   :  { %v6667_v30 = vpop.eup %6666 }
 0x106   :  { %v6669_v31 = vpop.eup %6668  ;;  %v5080_v32 = vadd.f32 -1.0, %v6667_v30 }
 0x107   :  { %v6671_v33 = vpop.eup %6670  ;;  %v5078_v34 = vadd.f32 -1.0, %v6669_v31 }
 0x108   :  { %v311_v35 = vsel %vm296_vm1, %v289_v14, %v5080_v32  ;;  %v5079_v36 = vadd.f32 -1.0, %v6671_v33 }
 0x109   :  { %v7004_v38 = vpack.c.bf16 %v311_v35, %v311_v35  ;;  %v309_v39 = vsel %vm294_vm2, %v248_v17, %v5078_v34 }
 0x10a   :  { %v310_v42 = vsel %vm295_vm4, %v250_v21, %v5079_v36  ;;  %v7016_v44 = vpack.c.bf16 %v309_v39, %v309_v39 }
 0x10b   :  { %v7012_v43 = vpack.c.bf16 %v310_v42, %v310_v42  ;;  %5207 = vmatmul.mubr.msk.bf16.vlgmr.msra.gmra.mrb[4].mxu1 %vm1144_vm3, %v7004_v38 }
 0x10c   :  { %1231 = vmatpush1.bf16.msra.mxu1 %v5991_v37 }
 0x10d   :  { %1180 = vmatprep.mubr.bf16.mxu0 %v7012_v43  ;;  %1262 = vmatprep.mubr.bf16.mxu1 %v7012_v43 }
 0x10e   :  { %1181 = vmatmul.mubr.bf16.vlgmr.msra.gmra.mrb[4].mxu0 %v7016_v44  ;;  %1232 = vmatprep.subr.bf16.mxu1 %v5999_v41 }
 0x10f   :  { %1313 = vmatpush1.bf16.msra.mxu0 %v5994_v40  ;;  %1344 = vmatprep.mubr.bf16.mxu0 %v7012_v43 }
 0x110   :  { %1233 = vmatpush1.bf16.msra.mxu1 %v5997_v45  ;;  %1314 = vmatprep.subr.bf16.mxu0 %v6002_v46 }
 0x111   :  { %1234 = vmatprep.subr.bf16.mxu1 %v6005_v48 }
 0x113   :  { %1315 = vmatpush1.bf16.msra.mxu0 %v6000_v47 }
 0x114   :  { %1235 = vmatpush1.bf16.msra.mxu1 %v6003_v49  ;;  %1316 = vmatprep.subr.bf16.mxu0 %v6008_v50 }
 0x115   :  { %1236 = vmatprep.subr.bf16.mxu1 %v6011_v52 }
 0x117   :  { %1317 = vmatpush1.bf16.msra.mxu0 %v6006_v51 }
 0x118   :  { %1237 = vmatpush1.bf16.msra.mxu1 %v6009_v53  ;;  %1318 = vmatprep.subr.bf16.mxu0 %v6014_v54 }
 0x119   :  { %1238 = vmatprep.subr.bf16.mxu1 %v6017_v56 }
 0x11b   :  { %1319 = vmatpush1.bf16.msra.mxu0 %v6012_v55 }
 0x11c   :  { %1239 = vmatpush1.bf16.msra.mxu1 %v6015_v57  ;;  %1320 = vmatprep.subr.bf16.mxu0 %v6020_v58 }
 0x11d   :  { %1240 = vmatprep.subr.bf16.mxu1 %v6023_v60 }
 0x11f   :  { %1321 = vmatpush1.bf16.msra.mxu0 %v6018_v59 }
 0x120   :  { %1241 = vmatpush1.bf16.msra.mxu1 %v6021_v61  ;;  %1322 = vmatprep.subr.bf16.mxu0 %v6026_v62 }
 0x121   :  { %1242 = vmatprep.subr.bf16.mxu1 %v6029_v0 }
 0x123   :  { %1323 = vmatpush1.bf16.msra.mxu0 %v6024_v63 }
 0x124   :  { %14 = vsyncpa [#allocation3], 0  ;;  %1243 = vmatpush1.bf16.msra.mxu1 %v6027_v2  ;;  %1324 = vmatprep.subr.bf16.mxu0 %v6032_v6  ;;  %v6033_v12 = vld [vmem:[%s8628_s3 + $0x190] ss:$28 sps:$4 sm:$0xff]   ;;  %v6038_v13 = vld [vmem:[%s8628_s3 + $0x19c] ss:$28 sps:$4 sm:$0xff]  }
 0x125   :  { %1244 = vmatprep.subr.bf16.mxu1 %v6035_v10  ;;  %v6041_v14 = vld [vmem:[%s8628_s3 + $0x1cc] ss:$28 sps:$4 sm:$0xff]   ;;  %v6036_v15 = vld [vmem:[%s8628_s3 + $0x198] ss:$28 sps:$4 sm:$0xff]   ;;  %v6047_v18 = vld [vmem:[%s8628_s3 + $0x204] ss:$28 sps:$4 sm:$0xff]  }
 0x126   :  { %v6039_v16 = vld [vmem:[%s8628_s3 + $0x1c8] ss:$28 sps:$4 sm:$0xff]   ;;  %v6044_v17 = vld [vmem:[%s8628_s3 + $0x1d4] ss:$28 sps:$4 sm:$0xff]   ;;  %v6045_v20 = vld [vmem:[%s8628_s3 + $0x200] ss:$28 sps:$4 sm:$0xff]  }
 0x127   :  { %1325 = vmatpush1.bf16.msra.mxu0 %v6030_v11  ;;  %v6042_v19 = vld [vmem:[%s8628_s3 + $0x1d0] ss:$28 sps:$4 sm:$0xff]   ;;  %v6053_v22 = vld [vmem:[%s8628_s3 + $0x23c] ss:$28 sps:$4 sm:$0xff]   ;;  %v6048_v23 = vld [vmem:[%s8628_s3 + $0x208] ss:$28 sps:$4 sm:$0xff]  }
 0x128   :  { %1245 = vmatpush1.bf16.msra.mxu1 %v6033_v12  ;;  %1326 = vmatprep.subr.bf16.mxu0 %v6038_v13  ;;  %v6050_v21 = vld [vmem:[%s8628_s3 + $0x20c] ss:$28 sps:$4 sm:$0xff]   ;;  %v6051_v24 = vld [vmem:[%s8628_s3 + $0x238] ss:$28 sps:$4 sm:$0xff]   ;;  %v6056_v25 = vld [vmem:[%s8628_s3 + $0x244] ss:$28 sps:$4 sm:$0xff]  }
 0x129   :  { %1246 = vmatprep.subr.bf16.mxu1 %v6041_v14  ;;  %v6059_v26 = vld [vmem:[%s8628_s3 + $0x274] ss:$28 sps:$4 sm:$0xff]   ;;  %v6054_v27 = vld [vmem:[%s8628_s3 + $0x240] ss:$28 sps:$4 sm:$0xff]   ;;  %v6065_v30 = vld [vmem:[%s8628_s3 + $0x2ac] ss:$28 sps:$4 sm:$0xff]  }
 0x12a   :  { %v6057_v28 = vld [vmem:[%s8628_s3 + $0x270] ss:$28 sps:$4 sm:$0xff]   ;;  %v6062_v29 = vld [vmem:[%s8628_s3 + $0x27c] ss:$28 sps:$4 sm:$0xff]   ;;  %v6063_v32 = vld [vmem:[%s8628_s3 + $0x2a8] ss:$28 sps:$4 sm:$0xff]  }
 0x12b   :  { %1327 = vmatpush1.bf16.msra.mxu0 %v6036_v15  ;;  %v6060_v31 = vld [vmem:[%s8628_s3 + $0x278] ss:$28 sps:$4 sm:$0xff]   ;;  %v6071_v34 = vld [vmem:[%s8628_s3 + $0x2e4] ss:$28 sps:$4 sm:$0xff]   ;;  %v6066_v35 = vld [vmem:[%s8628_s3 + $0x2b0] ss:$28 sps:$4 sm:$0xff]  }
 0x12c   :  { %1247 = vmatpush1.bf16.msra.mxu1 %v6039_v16  ;;  %1328 = vmatprep.subr.bf16.mxu0 %v6044_v17  ;;  %v6068_v33 = vld [vmem:[%s8628_s3 + $0x2b4] ss:$28 sps:$4 sm:$0xff]   ;;  %v6069_v36 = vld [vmem:[%s8628_s3 + $0x2e0] ss:$28 sps:$4 sm:$0xff]   ;;  %v6074_v37 = vld [vmem:[%s8628_s3 + $0x2ec] ss:$28 sps:$4 sm:$0xff]  }
 0x12d   :  { %1248 = vmatprep.subr.bf16.mxu1 %v6047_v18  ;;  %v6077_v39 = vld [vmem:[%s8628_s3 + $0x31c] ss:$28 sps:$4 sm:$0xff]   ;;  %v6072_v40 = vld [vmem:[%s8628_s3 + $0x2e8] ss:$28 sps:$4 sm:$0xff]   ;;  %v6083_v45 = vld [vmem:[%s8628_s3 + $0x354] ss:$28 sps:$4 sm:$0xff]  }
 0x12e   :  { %v6075_v41 = vld [vmem:[%s8628_s3 + $0x318] ss:$28 sps:$4 sm:$0xff]   ;;  %v6080_v42 = vld [vmem:[%s8628_s3 + $0x324] ss:$28 sps:$4 sm:$0xff]   ;;  %v6081_v47 = vld [vmem:[%s8628_s3 + $0x350] ss:$28 sps:$4 sm:$0xff]  }
 0x12f   :  { %1329 = vmatpush1.bf16.msra.mxu0 %v6042_v19  ;;  %v6078_v46 = vld [vmem:[%s8628_s3 + $0x320] ss:$28 sps:$4 sm:$0xff]   ;;  %v6089_v49 = vld [vmem:[%s8628_s3 + $0x38c] ss:$28 sps:$4 sm:$0xff]   ;;  %v6084_v50 = vld [vmem:[%s8628_s3 + $0x358] ss:$28 sps:$4 sm:$0xff]  }
 0x130   :  { %1249 = vmatpush1.bf16.msra.mxu1 %v6045_v20  ;;  %1330 = vmatprep.subr.bf16.mxu0 %v6050_v21  ;;  %v6086_v48 = vld [vmem:[%s8628_s3 + $0x35c] ss:$28 sps:$4 sm:$0xff]   ;;  %v6087_v51 = vld [vmem:[%s8628_s3 + $0x388] ss:$28 sps:$4 sm:$0xff]   ;;  %v6095_v52 = vld [vmem:[%s8628_s3 + $0x394] ss:$28 sps:$4 sm:$0xff]  }
 0x131   :  { %1250 = vmatprep.subr.bf16.mxu1 %v6053_v22  ;;  %v6092_v53 = vld [vmem:[%s8628_s3 + $0x3c4] ss:$28 sps:$4 sm:$0xff]   ;;  %v6093_v54 = vld [vmem:[%s8628_s3 + $0x390] ss:$28 sps:$4 sm:$0xff]   ;;  %v6099_v57 = vld [vmem:[%s8628_s3 + $0x1d8] ss:$28 sps:$4 sm:$0xff]  }
 0x132   :  { %v6090_v55 = vld [vmem:[%s8628_s3 + $0x3c0] ss:$28 sps:$4 sm:$0xff]   ;;  %v6098_v56 = vld [vmem:[%s8628_s3 + $0x3cc] ss:$28 sps:$4 sm:$0xff]   ;;  %v6100_v60 = vld [vmem:[%s8628_s3 + $0x18] ss:$28 sps:$4 sm:$0xff]  }
 0x133   :  { %1331 = vmatpush1.bf16.msra.mxu0 %v6048_v23  ;;  %v6096_v58 = vld [vmem:[%s8628_s3 + $0x3c8] ss:$28 sps:$4 sm:$0xff]   ;;  %v6101_v61 = vld [vmem:[%s8628_s3 + $0x210] ss:$28 sps:$4 sm:$0xff]   ;;  %v6134_v10 = vld [vmem:[%s8630_s5 + $0x7c] ss:$28 sps:$4 sm:$0xff]  }
 0x134   :  { %1251 = vmatpush1.bf16.msra.mxu1 %v6051_v24  ;;  %1332 = vmatprep.subr.bf16.mxu0 %v6056_v25  ;;  %v6122_v59 = vld [vmem:[%s8630_s5 + $0xc] ss:$28 sps:$4 sm:$0xff]   ;;  %v6128_v0 = vld [vmem:[%s8630_s5 + $0x44] ss:$28 sps:$4 sm:$0xff]   ;;  %v6132_v12 = vld [vmem:[%s8630_s5 + $0x78] ss:$28 sps:$4 sm:$0xff]  }
 0x135   :  { %1252 = vmatprep.subr.bf16.mxu1 %v6059_v26  ;;  %v6120_v62 = vld [vmem:[%s8630_s5 + $0x8] ss:$28 sps:$4 sm:$0xff]   ;;  %v6102_v63 = vld [vmem:[%s8628_s3 + $0x50] ss:$28 sps:$4 sm:$0xff]   ;;  %v6105_v11 = vld [vmem:[%s8628_s3 + $0x280] ss:$28 sps:$4 sm:$0xff]  }
 0x136   :  { %v6103_v2 = vld [vmem:[%s8628_s3 + $0x248] ss:$28 sps:$4 sm:$0xff]   ;;  %v6106_v13 = vld [vmem:[%s8628_s3 + $0xc0] ss:$28 sps:$4 sm:$0xff]   ;;  %v6140_v14 = vld [vmem:[%s8630_s5 + $0xb4] ss:$28 sps:$4 sm:$0xff]  }
 0x137   :  { %1333 = vmatpush1.bf16.msra.mxu0 %v6054_v27  ;;  %v6104_v6 = vld [vmem:[%s8628_s3 + $0x88] ss:$28 sps:$4 sm:$0xff]   ;;  %v6107_v15 = vld [vmem:[%s8628_s3 + $0x2b8] ss:$28 sps:$4 sm:$0xff]   ;;  %v6138_v16 = vld [vmem:[%s8630_s5 + $0xb0] ss:$28 sps:$4 sm:$0xff]  }
 0x138   :  { %1253 = vmatpush1.bf16.msra.mxu1 %v6057_v28  ;;  %1334 = vmatprep.subr.bf16.mxu0 %v6062_v29  ;;  %v6108_v17 = vld [vmem:[%s8628_s3 + $0xf8] ss:$28 sps:$4 sm:$0xff]   ;;  %v6146_v18 = vld [vmem:[%s8630_s5 + $0xec] ss:$28 sps:$4 sm:$0xff]   ;;  %v6152_v22 = vld [vmem:[%s8630_s5 + $0x124] ss:$28 sps:$4 sm:$0xff]  }
 0x139   :  { %1254 = vmatprep.subr.bf16.mxu1 %v6065_v30  ;;  %v6109_v19 = vld [vmem:[%s8628_s3 + $0x2f0] ss:$28 sps:$4 sm:$0xff]   ;;  %v6144_v20 = vld [vmem:[%s8630_s5 + $0xe8] ss:$28 sps:$4 sm:$0xff]   ;;  %v6150_v24 = vld [vmem:[%s8630_s5 + $0x120] ss:$28 sps:$4 sm:$0xff]  }
 0x13a   :  { %v6110_v21 = vld [vmem:[%s8628_s3 + $0x130] ss:$28 sps:$4 sm:$0xff]   ;;  %v6111_v23 = vld [vmem:[%s8628_s3 + $0x328] ss:$28 sps:$4 sm:$0xff]   ;;  %v6158_v26 = vld [vmem:[%s8630_s5 + $0x15c] ss:$28 sps:$4 sm:$0xff]  }
 0x13b   :  { %1335 = vmatpush1.bf16.msra.mxu0 %v6060_v31  ;;  %v6112_v25 = vld [vmem:[%s8628_s3 + $0x168] ss:$28 sps:$4 sm:$0xff]   ;;  %v6113_v27 = vld [vmem:[%s8628_s3 + $0x360] ss:$28 sps:$4 sm:$0xff]   ;;  %v6156_v28 = vld [vmem:[%s8630_s5 + $0x158] ss:$28 sps:$4 sm:$0xff]  }
 0x13c   :  { %1255 = vmatpush1.bf16.msra.mxu1 %v6063_v32  ;;  %1336 = vmatprep.subr.bf16.mxu0 %v6068_v33  ;;  %v6114_v29 = vld [vmem:[%s8628_s3 + $0x1a0] ss:$28 sps:$4 sm:$0xff]   ;;  %v6164_v30 = vld [vmem:[%s8630_s5 + $0x194] ss:$28 sps:$4 sm:$0xff]   ;;  %v6170_v33 = vld [vmem:[%s8630_s5 + $0x1cc] ss:$28 sps:$4 sm:$0xff]  }
 0x13d   :  { %1256 = vmatprep.subr.bf16.mxu1 %v6071_v34  ;;  %v6162_v31 = vld [vmem:[%s8630_s5 + $0x190] ss:$28 sps:$4 sm:$0xff]   ;;  %v6115_v32 = vld [vmem:[%s8628_s3 + $0x398] ss:$28 sps:$4 sm:$0xff]   ;;  %v6168_v34 = vld [vmem:[%s8630_s5 + $0x1c8] ss:$28 sps:$4 sm:$0xff]  }
 0x13e   :  { %vm4863_vm1 = vcmask 130048  }
 0x13f   :  { %1337 = vmatpush1.bf16.msra.mxu0 %v6066_v35  ;;  %v6116_v35 = vld [vmem:[%s8628_s3 + $0x3d0] ss:$28 sps:$4 sm:$0xff]  }
 0x140   :  { %1257 = vmatpush1.bf16.msra.mxu1 %v6069_v36  ;;  %1338 = vmatprep.subr.bf16.mxu0 %v6074_v37  ;;  %v6176_v36 = vld [vmem:[%s8630_s5 + $0x204] ss:$28 sps:$4 sm:$0xff]  }
 0x141   :  { %1258 = vmatprep.subr.bf16.mxu1 %v6077_v39  ;;  %v6174_v37 = vld [vmem:[%s8630_s5 + $0x200] ss:$28 sps:$4 sm:$0xff]  }
 0x142   :  { %v6117_v39 = vld [vmem:[%s8630_s5] ss:$28 sps:$4 sm:$0xff]  }
 0x143   :  { %1339 = vmatpush1.bf16.msra.mxu0 %v6072_v40  ;;  %v6182_v40 = vld [vmem:[%s8630_s5 + $0x23c] ss:$28 sps:$4 sm:$0xff]  }
 0x144   :  { %1259 = vmatpush1.bf16.msra.mxu1 %v6075_v41  ;;  %1340 = vmatprep.subr.bf16.mxu0 %v6080_v42  ;;  %v6125_v41 = vld [vmem:[%s8630_s5 + $0x3c] ss:$28 sps:$4 sm:$0xff]  }
 0x145   :  { %1260 = vmatprep.subr.bf16.mxu1 %v6083_v45  ;;  %v6180_v42 = vld [vmem:[%s8630_s5 + $0x238] ss:$28 sps:$4 sm:$0xff]  }
 0x146   :  { %v6123_v45 = vld [vmem:[%s8630_s5 + $0x38] ss:$28 sps:$4 sm:$0xff]  }
 0x147   :  { %1341 = vmatpush1.bf16.msra.mxu0 %v6078_v46  ;;  %v6188_v46 = vld [vmem:[%s8630_s5 + $0x274] ss:$28 sps:$4 sm:$0xff]  }
 0x148   :  { %1261 = vmatpush1.bf16.msra.mxu1 %v6081_v47  ;;  %1342 = vmatprep.subr.bf16.mxu0 %v6086_v48  ;;  %v6186_v47 = vld [vmem:[%s8630_s5 + $0x270] ss:$28 sps:$4 sm:$0xff]  }
 0x149   :  { %1271 = vmatprep.subr.bf16.mxu1 %v6089_v49  ;;  %v6129_v48 = vld [vmem:[%s8630_s5 + $0x70] ss:$28 sps:$4 sm:$0xff]  }
 0x14a   :  { %v6194_v49 = vld [vmem:[%s8630_s5 + $0x2ac] ss:$28 sps:$4 sm:$0xff]  }
 0x14b   :  { %1263 = vmatmul.mubr.bf16.vlgmr.msra.gmra.mrb[8].mxu1 %v7016_v44  ;;  %1343 = vmatpush1.bf16.msra.mxu0 %v6084_v50  ;;  %v6137_v50 = vld [vmem:[%s8630_s5 + $0xac] ss:$28 sps:$4 sm:$0xff]  }
 0x14c   :  { %1272 = vmatpush1.bf16.msra.mxu1 %v6087_v51  ;;  %1353 = vmatprep.subr.bf16.mxu0 %v6095_v52  ;;  %v6192_v51 = vld [vmem:[%s8630_s5 + $0x2a8] ss:$28 sps:$4 sm:$0xff]  }
 0x14d   :  { %1273 = vmatprep.subr.bf16.mxu1 %v6092_v53  ;;  %1303 = vmatprep.mubr.bf16.mxu1 %v6730_v5  ;;  %v6135_v52 = vld [vmem:[%s8630_s5 + $0xa8] ss:$28 sps:$4 sm:$0xff]  }
 0x14e   :  { %1345 = vmatmul.mubr.bf16.vlgmr.msra.gmra.mrb[8].mxu0 %v7016_v44  ;;  %v6200_v53 = vld [vmem:[%s8630_s5 + $0x2e4] ss:$28 sps:$4 sm:$0xff]  }
 0x14f   :  { %1354 = vmatpush1.bf16.msra.mxu0 %v6093_v54  ;;  %1385 = vmatprep.mubr.bf16.mxu0 %v6730_v5  ;;  %v6143_v54 = vld [vmem:[%s8630_s5 + $0xe4] ss:$28 sps:$4 sm:$0xff]  }
 0x150   :  { %1274 = vmatpush1.bf16.msra.mxu1 %v6090_v55  ;;  %1355 = vmatprep.subr.bf16.mxu0 %v6098_v56  ;;  %v6198_v55 = vld [vmem:[%s8630_s5 + $0x2e0] ss:$28 sps:$4 sm:$0xff]  }
 0x151   :  { %5639 = vmatprep.subr.bf16.mxu1 %v6099_v57  ;;  %v6141_v56 = vld [vmem:[%s8630_s5 + $0xe0] ss:$28 sps:$4 sm:$0xff]  }
 0x152   :  { %v6206_v57 = vld [vmem:[%s8630_s5 + $0x31c] ss:$28 sps:$4 sm:$0xff]  }
 0x153   :  { %1356 = vmatpush1.bf16.msra.mxu0 %v6096_v58  ;;  %v6149_v58 = vld [vmem:[%s8630_s5 + $0x11c] ss:$28 sps:$4 sm:$0xff]  }
 0x154   :  { %3927 = vmatprep.subr.bf16.mxu0 %v6122_v59  ;;  %v6204_v59 = vld [vmem:[%s8630_s5 + $0x318] ss:$28 sps:$4 sm:$0xff]  }
 0x157   :  { %5208 = vmatmul.mubr.msk.bf16.vlgmr.msra.gmra.mrb[8].mxu1 %vm1144_vm3, %v7004_v38 }
 0x158   :  { %5640 = vmatpush3.bf16.msra.mxu1 %v6100_v60  ;;  %1426 = vmatprep.mubr.bf16.mxu1 %v7012_v43  ;;  %v6126_v43 = vld [vmem:[%s8630_s5 + $0x40] ss:$28 sps:$4 sm:$0xff]   ;;  %v6147_v60 = vld [vmem:[%s8630_s5 + $0x118] ss:$28 sps:$4 sm:$0xff]  }
 0x159   :  { %5641 = vmatprep.subr.bf16.mxu1 %v6101_v61  ;;  %v6212_v61 = vld [vmem:[%s8630_s5 + $0x354] ss:$28 sps:$4 sm:$0xff]  }
 0x15a   :  { %5209 = vmatmul.mubr.msk.bf16.vlgmr.msra.gmra.mrb[8].mxu0 %vm1144_vm3, %v7004_v38 }
 0x15b   :  { %3928 = vmatpush1.bf16.msra.mxu0 %v6120_v62  ;;  %v6155_v62 = vld [vmem:[%s8630_s5 + $0x154] ss:$28 sps:$4 sm:$0xff]  }
 0x15c   :  { %5642 = vmatpush3.bf16.msra.mxu1 %v6102_v63  ;;  %3929 = vmatprep.subr.bf16.mxu0 %v6128_v0  ;;  %v6210_v63 = vld [vmem:[%s8630_s5 + $0x350] ss:$28 sps:$4 sm:$0xff]  }
 0x15d   :  { %5643 = vmatprep.subr.bf16.mxu1 %v6103_v2  ;;  %v6153_v0 = vld [vmem:[%s8630_s5 + $0x150] ss:$28 sps:$4 sm:$0xff]  }
 0x15e   :  { %v6218_v2 = vld [vmem:[%s8630_s5 + $0x38c] ss:$28 sps:$4 sm:$0xff]  }
 0x15f   :  { %3930 = vmatpush1.bf16.msra.mxu0 %v6126_v43  ;;  %v6161_v43 = vld [vmem:[%s8630_s5 + $0x18c] ss:$28 sps:$4 sm:$0xff]  }
 0x160   :  { %5644 = vmatpush3.bf16.msra.mxu1 %v6104_v6  ;;  %3931 = vmatprep.subr.bf16.mxu0 %v6134_v10  ;;  %v6159_v6 = vld [vmem:[%s8630_s5 + $0x188] ss:$28 sps:$4 sm:$0xff]  }
 0x161   :  { %5645 = vmatprep.subr.bf16.mxu1 %v6105_v11  ;;  %v6167_v10 = vld [vmem:[%s8630_s5 + $0x1c4] ss:$28 sps:$4 sm:$0xff]  }
 0x162   :  { %v6165_v11 = vld [vmem:[%s8630_s5 + $0x1c0] ss:$28 sps:$4 sm:$0xff]  }
 0x163   :  { %3932 = vmatpush1.bf16.msra.mxu0 %v6132_v12  ;;  %v6173_v12 = vld [vmem:[%s8630_s5 + $0x1fc] ss:$28 sps:$4 sm:$0xff]  }
 0x164   :  { %5646 = vmatpush3.bf16.msra.mxu1 %v6106_v13  ;;  %3933 = vmatprep.subr.bf16.mxu0 %v6140_v14  ;;  %v6171_v13 = vld [vmem:[%s8630_s5 + $0x1f8] ss:$28 sps:$4 sm:$0xff]  }
 0x165   :  { %5647 = vmatprep.subr.bf16.mxu1 %v6107_v15  ;;  %v6179_v14 = vld [vmem:[%s8630_s5 + $0x234] ss:$28 sps:$4 sm:$0xff]  }
 0x166   :  { %v6177_v15 = vld [vmem:[%s8630_s5 + $0x230] ss:$28 sps:$4 sm:$0xff]  }
 0x167   :  { %3934 = vmatpush1.bf16.msra.mxu0 %v6138_v16  ;;  %v6185_v16 = vld [vmem:[%s8630_s5 + $0x26c] ss:$28 sps:$4 sm:$0xff]  }
 0x168   :  { %5648 = vmatpush3.bf16.msra.mxu1 %v6108_v17  ;;  %3935 = vmatprep.subr.bf16.mxu0 %v6146_v18  ;;  %v6183_v17 = vld [vmem:[%s8630_s5 + $0x268] ss:$28 sps:$4 sm:$0xff]  }
 0x169   :  { %5649 = vmatprep.subr.bf16.mxu1 %v6109_v19  ;;  %v6191_v18 = vld [vmem:[%s8630_s5 + $0x2a4] ss:$28 sps:$4 sm:$0xff]  }
 0x16a   :  { %v6189_v19 = vld [vmem:[%s8630_s5 + $0x2a0] ss:$28 sps:$4 sm:$0xff]  }
 0x16b   :  { %3936 = vmatpush1.bf16.msra.mxu0 %v6144_v20  ;;  %v6197_v20 = vld [vmem:[%s8630_s5 + $0x2dc] ss:$28 sps:$4 sm:$0xff]  }
 0x16c   :  { %5650 = vmatpush3.bf16.msra.mxu1 %v6110_v21  ;;  %3937 = vmatprep.subr.bf16.mxu0 %v6152_v22  ;;  %v6195_v21 = vld [vmem:[%s8630_s5 + $0x2d8] ss:$28 sps:$4 sm:$0xff]  }
 0x16d   :  { %5651 = vmatprep.subr.bf16.mxu1 %v6111_v23  ;;  %v6203_v22 = vld [vmem:[%s8630_s5 + $0x314] ss:$28 sps:$4 sm:$0xff]  }
 0x16e   :  { %v6201_v23 = vld [vmem:[%s8630_s5 + $0x310] ss:$28 sps:$4 sm:$0xff]  }
 0x16f   :  { %3938 = vmatpush1.bf16.msra.mxu0 %v6150_v24  ;;  %v6209_v24 = vld [vmem:[%s8630_s5 + $0x34c] ss:$28 sps:$4 sm:$0xff]  }
 0x170   :  { %5652 = vmatpush3.bf16.msra.mxu1 %v6112_v25  ;;  %3939 = vmatprep.subr.bf16.mxu0 %v6158_v26  ;;  %v6207_v25 = vld [vmem:[%s8630_s5 + $0x348] ss:$28 sps:$4 sm:$0xff]  }
 0x171   :  { %5653 = vmatprep.subr.bf16.mxu1 %v6113_v27  ;;  %v6215_v26 = vld [vmem:[%s8630_s5 + $0x384] ss:$28 sps:$4 sm:$0xff]  }
 0x172   :  { %v7494_v27 = vld [vmem:[%s8629_s4] sm:$0x7f] }
 0x173   :  { %3940 = vmatpush1.bf16.msra.mxu0 %v6156_v28 }
 0x174   :  { %5654 = vmatpush3.bf16.msra.mxu1 %v6114_v29  ;;  %3941 = vmatprep.subr.bf16.mxu0 %v6164_v30  ;;  %v464_v29 = vrot.slane %v7494_v27, %v6993_v8 }
 0x175   :  { %5821 = vmatprep.subr.bf16.mxu1 %v6728_v1 }
 0x177   :  { %1427 = vmatmul.mubr.bf16.vlgmr.msra.gmra.mrb[12].mxu1 %v7016_v44  ;;  %3942 = vmatpush1.bf16.msra.mxu0 %v6162_v31  ;;  %v6119_v44 = vld [vmem:[%s8630_s5 + $0x4] ss:$28 sps:$4 sm:$0xff]   ;;  %v468_v31 = vrot.slane %v7494_v27, %v6996_v9 }
 0x178   :  { %5822 = vmatpush3.bf16.msra.mxu1 %v6115_v32  ;;  %5825 = vmatprep.mubr.msk.bf16.mxu1 %vm6729_vm0, %v6728_v1 }
 0x179   :  { %5823 = vmatprep.subr.bf16.mxu1 %v6728_v1  ;;  %3943 = vmatprep.subr.bf16.mxu0 %v6170_v33 }
 0x17b   :  { %3944 = vmatpush1.bf16.msra.mxu0 %v6168_v34 }
 0x17c   :  { %5824 = vmatpush3.bf16.msra.mxu1 %v6116_v35  ;;  %3945 = vmatprep.subr.bf16.mxu0 %v6176_v36 }
 0x17d   :  { %3763 = vmatprep.subr.bf16.mxu1 %v6119_v44 }
 0x17f   :  { %5826 = vmatmul.mubr.msk.bf16.vlgmr.msra.gmra.mrb[16].mxu1 %vm1144_vm3, %v7004_v38  ;;  %3946 = vmatpush1.bf16.msra.mxu0 %v6174_v37  ;;  %v6131_v38 = vld [vmem:[%s8630_s5 + $0x74] ss:$28 sps:$4 sm:$0xff]  }
 0x180   :  { %3764 = vmatpush1.bf16.msra.mxu1 %v6117_v39  ;;  %3947 = vmatprep.subr.bf16.mxu0 %v6182_v40 }
 0x181   :  { %3765 = vmatprep.subr.bf16.mxu1 %v6125_v41 }
 0x183   :  { %3948 = vmatpush1.bf16.msra.mxu0 %v6180_v42 }
 0x184   :  { %3766 = vmatpush1.bf16.msra.mxu1 %v6123_v45  ;;  %3949 = vmatprep.subr.bf16.mxu0 %v6188_v46 }
 0x185   :  { %3767 = vmatprep.subr.bf16.mxu1 %v6131_v38 }
 0x187   :  { %3950 = vmatpush1.bf16.msra.mxu0 %v6186_v47 }
 0x188   :  { %3768 = vmatpush1.bf16.msra.mxu1 %v6129_v48  ;;  %3951 = vmatprep.subr.bf16.mxu0 %v6194_v49 }
 0x189   :  { %3769 = vmatprep.subr.bf16.mxu1 %v6137_v50 }
 0x18b   :  { %3952 = vmatpush1.bf16.msra.mxu0 %v6192_v51 }
 0x18c   :  { %3770 = vmatpush1.bf16.msra.mxu1 %v6135_v52  ;;  %3953 = vmatprep.subr.bf16.mxu0 %v6200_v53 }
 0x18d   :  { %3771 = vmatprep.subr.bf16.mxu1 %v6143_v54  ;;  %v6213_v54 = vld [vmem:[%s8630_s5 + $0x380] ss:$28 sps:$4 sm:$0xff]  }
 0x18f   :  { %3954 = vmatpush1.bf16.msra.mxu0 %v6198_v55  ;;  %v6216_v55 = vld [vmem:[%s8630_s5 + $0x388] ss:$28 sps:$4 sm:$0xff]  }
 0x190   :  { %3772 = vmatpush1.bf16.msra.mxu1 %v6141_v56  ;;  %3955 = vmatprep.subr.bf16.mxu0 %v6206_v57  ;;  %v6221_v57 = vld [vmem:[%s8630_s5 + $0x3bc] ss:$28 sps:$4 sm:$0xff]  }
 0x191   :  { %3773 = vmatprep.subr.bf16.mxu1 %v6149_v58  ;;  %v6224_v58 = vld [vmem:[%s8630_s5 + $0x3c4] ss:$28 sps:$4 sm:$0xff]  }
 0x193   :  { %3956 = vmatpush1.bf16.msra.mxu0 %v6204_v59  ;;  %v6219_v59 = vld [vmem:[%s8630_s5 + $0x3b8] ss:$28 sps:$4 sm:$0xff]  }
 0x194   :  { %3774 = vmatpush1.bf16.msra.mxu1 %v6147_v60  ;;  %3957 = vmatprep.subr.bf16.mxu0 %v6212_v61  ;;  %v6222_v60 = vld [vmem:[%s8630_s5 + $0x3c0] ss:$28 sps:$4 sm:$0xff]   ;;  %v6227_v61 = vld [vmem:[%s8630_s5 + $0x3f4] ss:$28 sps:$4 sm:$0xff]  }
 0x195   :  { %3775 = vmatprep.subr.bf16.mxu1 %v6155_v62  ;;  %v6230_v62 = vld [vmem:[%s8630_s5 + $0x3fc] ss:$28 sps:$4 sm:$0xff]  }
 0x197   :  { %3958 = vmatpush1.bf16.msra.mxu0 %v6210_v63  ;;  %v6225_v63 = vld [vmem:[%s8630_s5 + $0x3f0] ss:$28 sps:$4 sm:$0xff]  }
 0x198   :  { %3776 = vmatpush1.bf16.msra.mxu1 %v6153_v0  ;;  %3968 = vmatprep.subr.bf16.mxu0 %v6218_v2  ;;  %v6228_v0 = vld [vmem:[%s8630_s5 + $0x3f8] ss:$28 sps:$4 sm:$0xff]   ;;  %v6233_v2 = vld [vmem:[%s8630_s5 + $0x42c] ss:$28 sps:$4 sm:$0xff]  }
 0x199   :  { %3777 = vmatprep.subr.bf16.mxu1 %v6161_v43  ;;  %v6236_v43 = vld [vmem:[%s8630_s5 + $0x434] ss:$28 sps:$4 sm:$0xff]  }
 0x19c   :  { %3778 = vmatpush1.bf16.msra.mxu1 %v6159_v6  ;;  %v6231_v6 = vld [vmem:[%s8630_s5 + $0x428] ss:$28 sps:$4 sm:$0xff]  }
 0x19d   :  { %3779 = vmatprep.subr.bf16.mxu1 %v6167_v10  ;;  %v6234_v10 = vld [vmem:[%s8630_s5 + $0x430] ss:$28 sps:$4 sm:$0xff]  }
 0x1a0   :  { %3780 = vmatpush1.bf16.msra.mxu1 %v6165_v11  ;;  %v6239_v11 = vld [vmem:[%s8630_s5 + $0x464] ss:$28 sps:$4 sm:$0xff]  }
 0x1a1   :  { %3781 = vmatprep.subr.bf16.mxu1 %v6173_v12  ;;  %v6242_v12 = vld [vmem:[%s8630_s5 + $0x46c] ss:$28 sps:$4 sm:$0xff]  }
 0x1a4   :  { %3782 = vmatpush1.bf16.msra.mxu1 %v6171_v13  ;;  %v6237_v13 = vld [vmem:[%s8630_s5 + $0x460] ss:$28 sps:$4 sm:$0xff]  }
 0x1a5   :  { %3783 = vmatprep.subr.bf16.mxu1 %v6179_v14  ;;  %v6240_v14 = vld [vmem:[%s8630_s5 + $0x468] ss:$28 sps:$4 sm:$0xff]  }
 0x1a8   :  { %3784 = vmatpush1.bf16.msra.mxu1 %v6177_v15  ;;  %v6245_v15 = vld [vmem:[%s8630_s5 + $0x49c] ss:$28 sps:$4 sm:$0xff]  }
 0x1a9   :  { %3785 = vmatprep.subr.bf16.mxu1 %v6185_v16  ;;  %v6248_v16 = vld [vmem:[%s8630_s5 + $0x4a4] ss:$28 sps:$4 sm:$0xff]  }
 0x1ac   :  { %3786 = vmatpush1.bf16.msra.mxu1 %v6183_v17  ;;  %v6243_v17 = vld [vmem:[%s8630_s5 + $0x498] ss:$28 sps:$4 sm:$0xff]  }
 0x1ad   :  { %3787 = vmatprep.subr.bf16.mxu1 %v6191_v18  ;;  %v6246_v18 = vld [vmem:[%s8630_s5 + $0x4a0] ss:$28 sps:$4 sm:$0xff]  }
 0x1b0   :  { %3788 = vmatpush1.bf16.msra.mxu1 %v6189_v19  ;;  %v6251_v19 = vld [vmem:[%s8630_s5 + $0x4d4] ss:$28 sps:$4 sm:$0xff]  }
 0x1b1   :  { %3789 = vmatprep.subr.bf16.mxu1 %v6197_v20  ;;  %v6254_v20 = vld [vmem:[%s8630_s5 + $0x4dc] ss:$28 sps:$4 sm:$0xff]  }
 0x1b4   :  { %3790 = vmatpush1.bf16.msra.mxu1 %v6195_v21  ;;  %v6249_v21 = vld [vmem:[%s8630_s5 + $0x4d0] ss:$28 sps:$4 sm:$0xff]  }
 0x1b5   :  { %3791 = vmatprep.subr.bf16.mxu1 %v6203_v22  ;;  %v6252_v22 = vld [vmem:[%s8630_s5 + $0x4d8] ss:$28 sps:$4 sm:$0xff]  }
 0x1b8   :  { %3792 = vmatpush1.bf16.msra.mxu1 %v6201_v23  ;;  %v6257_v23 = vld [vmem:[%s8630_s5 + $0x50c] ss:$28 sps:$4 sm:$0xff]  }
 0x1b9   :  { %3793 = vmatprep.subr.bf16.mxu1 %v6209_v24  ;;  %v6260_v24 = vld [vmem:[%s8630_s5 + $0x514] ss:$28 sps:$4 sm:$0xff]  }
 0x1bc   :  { %3794 = vmatpush1.bf16.msra.mxu1 %v6207_v25  ;;  %v6255_v25 = vld [vmem:[%s8630_s5 + $0x508] ss:$28 sps:$4 sm:$0xff]  }
 0x1bd   :  { %3804 = vmatprep.subr.bf16.mxu1 %v6215_v26  ;;  %v6258_v26 = vld [vmem:[%s8630_s5 + $0x510] ss:$28 sps:$4 sm:$0xff]  }
 0x1de   :  { %v1223_v28 = vpop.f32.mrb[4].mxu1 }
 0x1df   :  { %v1225_v30 = vpop.f32.mrb[5].mxu1 }
 0x1e0   :  { %v1227_v32 = vpop.f32.mrb[6].mxu1 }
 0x1e1   :  { %v1182_v33 = vpop.f32.mrb[4].mxu0  ;;  %v1228_v34 = vpop.f32.mrb[7].mxu1  ;;  %v6269_v32 = vld [vmem:[%s8630_s5 + $0x57c] ss:$28 sps:$4 sm:$0xff]  }
 0x1e2   :  { %v1183_v35 = vadd.f32 %v1182_v33, %v464_v29  ;;  %v1184_v36 = vpop.f32.mrb[5].mxu0  ;;  %v6266_v29 = vld [vmem:[%s8630_s5 + $0x54c] ss:$28 sps:$4 sm:$0xff]   ;;  %v6272_v33 = vld [vmem:[%s8630_s5 + $0x584] ss:$28 sps:$4 sm:$0xff]  }
 0x1e3   :  { %v1185_v44 = vadd.f32 %v1184_v36, %v468_v31  ;;  %v1186_v37 = vpop.f32.mrb[6].mxu0  ;;  %v6264_v31 = vld [vmem:[%s8630_s5 + $0x548] ss:$28 sps:$4 sm:$0xff]   ;;  %v6267_v34 = vld [vmem:[%s8630_s5 + $0x578] ss:$28 sps:$4 sm:$0xff]  }
 0x1e4   :  { %v1224_v39 = vadd.f32 %v1223_v28, %v1183_v35  ;;  %v1187_v40 = vpop.f32.mrb[7].mxu0  ;;  %v6263_v28 = vld [vmem:[%s8630_s5 + $0x544] ss:$28 sps:$4 sm:$0xff]   ;;  %v6275_v36 = vld [vmem:[%s8630_s5 + $0x5b4] ss:$28 sps:$4 sm:$0xff]  }
 0x1e5   :  { %v1226_v41 = vadd.f32 %v1225_v30, %v1185_v44  ;;  %v6261_v30 = vld [vmem:[%s8630_s5 + $0x540] ss:$28 sps:$4 sm:$0xff]   ;;  %v6273_v37 = vld [vmem:[%s8630_s5 + $0x5b0] ss:$28 sps:$4 sm:$0xff]  }
 0x1e6   :  { %v1481_v42 = vmin.f32 %v1224_v39, 0.0  ;;  %vm1474_vm5 = vcmp.gt.f32.partialorder %v1224_v39, 0.0  ;;  %v6270_v35 = vld [vmem:[%s8630_s5 + $0x580] ss:$28 sps:$4 sm:$0xff]   ;;  %v6281_v40 = vld [vmem:[%s8630_s5 + $0x5ec] ss:$28 sps:$4 sm:$0xff]  }
 0x1e7   :  { %v1482_v45 = vmin.f32 %v1226_v41, 0.0  ;;  %vm1475_vm6 = vcmp.gt.f32.partialorder %v1226_v41, 0.0  ;;  %v6278_v44 = vld [vmem:[%s8630_s5 + $0x5bc] ss:$28 sps:$4 sm:$0xff]  }
 0x1e8   :  { %v1488_v46 = vmul.f32 1.442695, %v1481_v42  ;;  %v475_v42 = vsub.s32 3, %v6984_v4 }
 0x1e9   :  { %v1490_v38 = vmul.f32 1.442695, %v1482_v45  ;;  %v6279_v45 = vld [vmem:[%s8630_s5 + $0x5e8] ss:$28 sps:$4 sm:$0xff]  }
 0x1ea   :  { %6672 = vpow2.f32 %v1488_v46  ;;  %v6282_v46 = vld [vmem:[%s8630_s5 + $0x5f0] ss:$28 sps:$4 sm:$0xff]  }
 0x1eb   :  { %6674 = vpow2.f32 %v1490_v38  ;;  %v6287_v38 = vld [vmem:[%s8630_s5 + $0x624] ss:$28 sps:$4 sm:$0xff]  }
 0x1f4   :  { %v6673_v47 = vpop.eup %6672 }
 0x1f5   :  { %v6675_v48 = vpop.eup %6674  ;;  %v5211_v49 = vadd.f32 -1.0, %v6673_v47  ;;  %v6290_v47 = vld [vmem:[%s8630_s5 + $0x62c] ss:$28 sps:$4 sm:$0xff]  }
 0x1f6   :  { %v5212_v50 = vadd.f32 -1.0, %v6675_v48  ;;  %v472_v48 = vrot.slane %v7494_v27, %v6990_v7 }
 0x1f7   :  { %v1509_v51 = vsel %vm1474_vm5, %v1224_v39, %v5211_v49  ;;  %v6276_v39 = vld [vmem:[%s8630_s5 + $0x5b8] ss:$28 sps:$4 sm:$0xff]   ;;  %v483_v49 = vsub.s32 5, %v6984_v4 }
 0x1f8   :  { %v1510_v52 = vsel %vm1475_vm6, %v1226_v41, %v5212_v50  ;;  %v7508_v56 = vpack.c.bf16 %v1509_v51, %v1509_v51  ;;  %v6284_v41 = vld [vmem:[%s8630_s5 + $0x5f4] ss:$28 sps:$4 sm:$0xff]   ;;  %v476_v50 = vrot.slane %v7494_v27, %v475_v42  ;;  %v6285_v51 = vld [vmem:[%s8630_s5 + $0x620] ss:$28 sps:$4 sm:$0xff]  }
 0x1f9   :  { %v7500_v53 = vpack.c.bf16 %v1510_v52, %v1510_v52  ;;  %v6288_v52 = vld [vmem:[%s8630_s5 + $0x628] ss:$28 sps:$4 sm:$0xff]  }
 0x1fb   :  { %3795 = vmatprep.mubr.bf16.mxu1 %v7500_v53  ;;  %3959 = vmatprep.mubr.bf16.mxu0 %v7500_v53 }
 0x1fc   :  { %3796 = vmatmul.mubr.bf16.vlgmr.msra.gmra.mrb[20].mxu1 %v7508_v56  ;;  %3960 = vmatmul.mubr.bf16.vlgmr.msra.gmra.mrb[12].mxu0 %v7508_v56 }
 0x1fd   :  { %3805 = vmatpush1.bf16.msra.mxu1 %v6213_v54  ;;  %3969 = vmatpush1.bf16.msra.mxu0 %v6216_v55  ;;  %v6293_v55 = vld [vmem:[%s8630_s5 + $0x65c] ss:$28 sps:$4 sm:$0xff]  }
 0x1fe   :  { %3806 = vmatprep.subr.bf16.mxu1 %v6221_v57  ;;  %3970 = vmatprep.subr.bf16.mxu0 %v6224_v58  ;;  %v6296_v57 = vld [vmem:[%s8630_s5 + $0x664] ss:$28 sps:$4 sm:$0xff]  }
 0x201   :  { %3807 = vmatpush1.bf16.msra.mxu1 %v6219_v59  ;;  %3971 = vmatpush1.bf16.msra.mxu0 %v6222_v60  ;;  %v484_v60 = vrot.slane %v7494_v27, %v483_v49 }
 0x202   :  { %3808 = vmatprep.subr.bf16.mxu1 %v6227_v61  ;;  %3972 = vmatprep.subr.bf16.mxu0 %v6230_v62 }
 0x205   :  { %3809 = vmatpush1.bf16.msra.mxu1 %v6225_v63  ;;  %3973 = vmatpush1.bf16.msra.mxu0 %v6228_v0  ;;  %v6291_v63 = vld [vmem:[%s8630_s5 + $0x658] ss:$28 sps:$4 sm:$0xff]  }
 0x206   :  { %3810 = vmatprep.subr.bf16.mxu1 %v6233_v2  ;;  %3974 = vmatprep.subr.bf16.mxu0 %v6236_v43 }
 0x209   :  { %3811 = vmatpush1.bf16.msra.mxu1 %v6231_v6  ;;  %3975 = vmatpush1.bf16.msra.mxu0 %v6234_v10  ;;  %v6294_v6 = vld [vmem:[%s8630_s5 + $0x660] ss:$28 sps:$4 sm:$0xff]  }
 0x20a   :  { %3812 = vmatprep.subr.bf16.mxu1 %v6239_v11  ;;  %3976 = vmatprep.subr.bf16.mxu0 %v6242_v12  ;;  %v6299_v12 = vld [vmem:[%s8630_s5 + $0x694] ss:$28 sps:$4 sm:$0xff]  }
 0x20d   :  { %3813 = vmatpush1.bf16.msra.mxu1 %v6237_v13  ;;  %3977 = vmatpush1.bf16.msra.mxu0 %v6240_v14  ;;  %v6302_v13 = vld [vmem:[%s8630_s5 + $0x69c] ss:$28 sps:$4 sm:$0xff]  }
 0x20e   :  { %3814 = vmatprep.subr.bf16.mxu1 %v6245_v15  ;;  %3978 = vmatprep.subr.bf16.mxu0 %v6248_v16 }
 0x211   :  { %3815 = vmatpush1.bf16.msra.mxu1 %v6243_v17  ;;  %3979 = vmatpush1.bf16.msra.mxu0 %v6246_v18 }
 0x212   :  { %3816 = vmatprep.subr.bf16.mxu1 %v6251_v19  ;;  %3980 = vmatprep.subr.bf16.mxu0 %v6254_v20  ;;  %v6297_v20 = vld [vmem:[%s8630_s5 + $0x690] ss:$28 sps:$4 sm:$0xff]  }
 0x215   :  { %3817 = vmatpush1.bf16.msra.mxu1 %v6249_v21  ;;  %3981 = vmatpush1.bf16.msra.mxu0 %v6252_v22  ;;  %v6300_v21 = vld [vmem:[%s8630_s5 + $0x698] ss:$28 sps:$4 sm:$0xff]   ;;  %v6305_v22 = vld [vmem:[%s8630_s5 + $0x6cc] ss:$28 sps:$4 sm:$0xff]  }
 0x216   :  { %3818 = vmatprep.subr.bf16.mxu1 %v6257_v23  ;;  %3982 = vmatprep.subr.bf16.mxu0 %v6260_v24  ;;  %v6308_v23 = vld [vmem:[%s8630_s5 + $0x6d4] ss:$28 sps:$4 sm:$0xff]  }
 0x219   :  { %3819 = vmatpush1.bf16.msra.mxu1 %v6255_v25  ;;  %3983 = vmatpush1.bf16.msra.mxu0 %v6258_v26  ;;  %v6303_v25 = vld [vmem:[%s8630_s5 + $0x6c8] ss:$28 sps:$4 sm:$0xff]   ;;  %v6306_v26 = vld [vmem:[%s8630_s5 + $0x6d0] ss:$28 sps:$4 sm:$0xff]  }
 0x21a   :  { %3820 = vmatprep.subr.bf16.mxu1 %v6263_v28  ;;  %3984 = vmatprep.subr.bf16.mxu0 %v6266_v29  ;;  %v6311_v28 = vld [vmem:[%s8630_s5 + $0x704] ss:$28 sps:$4 sm:$0xff]   ;;  %v6314_v29 = vld [vmem:[%s8630_s5 + $0x70c] ss:$28 sps:$4 sm:$0xff]  }
 0x21d   :  { %3821 = vmatpush1.bf16.msra.mxu1 %v6261_v30  ;;  %3985 = vmatpush1.bf16.msra.mxu0 %v6264_v31 }
 0x21e   :  { %3822 = vmatprep.subr.bf16.mxu1 %v6269_v32  ;;  %3986 = vmatprep.subr.bf16.mxu0 %v6272_v33 }
 0x221   :  { %3823 = vmatpush1.bf16.msra.mxu1 %v6267_v34  ;;  %3987 = vmatpush1.bf16.msra.mxu0 %v6270_v35 }
 0x222   :  { %3824 = vmatprep.subr.bf16.mxu1 %v6275_v36  ;;  %3988 = vmatprep.subr.bf16.mxu0 %v6278_v44 }
 0x225   :  { %3825 = vmatpush1.bf16.msra.mxu1 %v6273_v37  ;;  %3989 = vmatpush1.bf16.msra.mxu0 %v6276_v39  ;;  %v6309_v39 = vld [vmem:[%s8630_s5 + $0x700] ss:$28 sps:$4 sm:$0xff]  }
 0x226   :  { %3826 = vmatprep.subr.bf16.mxu1 %v6281_v40  ;;  %3990 = vmatprep.subr.bf16.mxu0 %v6284_v41  ;;  %v6312_v40 = vld [vmem:[%s8630_s5 + $0x708] ss:$28 sps:$4 sm:$0xff]  }
 0x229   :  { %3827 = vmatpush1.bf16.msra.mxu1 %v6279_v45  ;;  %3991 = vmatpush1.bf16.msra.mxu0 %v6282_v46  ;;  %v6317_v46 = vld [vmem:[%s8630_s5 + $0x73c] ss:$28 sps:$4 sm:$0xff]  }
 0x22a   :  { %v1305_v54 = vpop.f32.mrb[8].mxu1  ;;  %3828 = vmatprep.subr.bf16.mxu1 %v6287_v38  ;;  %3992 = vmatprep.subr.bf16.mxu0 %v6290_v47  ;;  %v6320_v38 = vld [vmem:[%s8630_s5 + $0x744] ss:$28 sps:$4 sm:$0xff]  }
 0x22b   :  { %v5847_v58 = vadd.f32 %v1305_v54, %v472_v48  ;;  %v1307_v59 = vpop.f32.mrb[9].mxu1  ;;  %v6315_v48 = vld [vmem:[%s8630_s5 + $0x738] ss:$28 sps:$4 sm:$0xff]   ;;  %v6321_v54 = vld [vmem:[%s8630_s5 + $0x770] ss:$28 sps:$4 sm:$0xff]  }
 0x22c   :  { %v5848_v61 = vadd.f32 %v1307_v59, %v476_v50  ;;  %v1309_v62 = vpop.f32.mrb[10].mxu1  ;;  %v6318_v50 = vld [vmem:[%s8630_s5 + $0x740] ss:$28 sps:$4 sm:$0xff]   ;;  %v487_v59 = vsub.s32 6, %v6984_v4 }
 0x22d   :  { %v1483_v0 = vmin.f32 %v5847_v58, 0.0  ;;  %v1310_v2 = vpop.f32.mrb[11].mxu1  ;;  %v7677_v43 = vpop.f32.mrb[8].mxu0  ;;  %3829 = vmatpush1.bf16.msra.mxu1 %v6285_v51  ;;  %3993 = vmatpush1.bf16.msra.mxu0 %v6288_v52  ;;  %vm1476_vm7 = vcmp.gt.f32.partialorder %v5847_v58, 0.0  ;;  %v6323_v51 = vld [vmem:[%s8630_s5 + $0x774] ss:$28 sps:$4 sm:$0xff]  }
 0x22e   :  { %v1484_v10 = vmin.f32 %v5848_v61, 0.0  ;;  %v1389_v11 = vpop.f32.mrb[9].mxu0  ;;  %3830 = vmatprep.subr.bf16.mxu1 %v6293_v55  ;;  %3994 = vmatprep.subr.bf16.mxu0 %v6296_v57  ;;  %vm1477_vm8 = vcmp.gt.f32.partialorder %v5848_v61, 0.0  ;;  %v6326_v52 = vld [vmem:[%s8630_s5 + $0x77c] ss:$28 sps:$4 sm:$0xff]  }
 0x22f   :  { %v1492_v14 = vmul.f32 1.442695, %v1483_v0  ;;  %v5850_v15 = vadd.f32 %v1389_v11, %v484_v60  ;;  %v1391_v16 = vpop.f32.mrb[10].mxu0  ;;  %v6324_v55 = vld [vmem:[%s8630_s5 + $0x778] ss:$28 sps:$4 sm:$0xff]  }
 0x230   :  { %v1494_v17 = vmul.f32 1.442695, %v1484_v10  ;;  %v1392_v18 = vpop.f32.mrb[11].mxu0  ;;  %v6329_v57 = vld [vmem:[%s8630_s5 + $0x7ac] ss:$28 sps:$4 sm:$0xff]   ;;  %v488_v10 = vrot.slane %v7494_v27, %v487_v59 }
 0x231   :  { %6676 = vpow2.f32 %v1492_v14  ;;  %v1486_v19 = vmin.f32 %v5850_v15, 0.0  ;;  %3831 = vmatpush1.bf16.msra.mxu1 %v6291_v63  ;;  %3995 = vmatpush1.bf16.msra.mxu0 %v6294_v6  ;;  %vm1479_vm9 = vcmp.gt.f32.partialorder %v5850_v15, 0.0  ;;  %v6327_v0 = vld [vmem:[%s8630_s5 + $0x7a8] ss:$28 sps:$4 sm:$0xff]   ;;  %v6330_v2 = vld [vmem:[%s8630_s5 + $0x7b0] ss:$28 sps:$4 sm:$0xff]  }
 0x232   :  { %6678 = vpow2.f32 %v1494_v17  ;;  %3832 = vmatprep.subr.bf16.mxu1 %v6299_v12  ;;  %3996 = vmatprep.subr.bf16.mxu0 %v6302_v13  ;;  %v6335_v11 = vld [vmem:[%s8630_s5 + $0x7e4] ss:$28 sps:$4 sm:$0xff]   ;;  %v6338_v12 = vld [vmem:[%s8630_s5 + $0x7ec] ss:$28 sps:$4 sm:$0xff]   ;;  %v6341_v16 = vld [vmem:[%s8630_s5 + $0x81c] ss:$28 sps:$4 sm:$0xff]  }
 0x233   :  { %v1498_v24 = vmul.f32 1.442695, %v1486_v19  ;;  %v6333_v13 = vld [vmem:[%s8630_s5 + $0x7e0] ss:$28 sps:$4 sm:$0xff]   ;;  %v6336_v14 = vld [vmem:[%s8630_s5 + $0x7e8] ss:$28 sps:$4 sm:$0xff]  }
 0x234   :  { %v6344_v17 = vld [vmem:[%s8630_s5 + $0x824] ss:$28 sps:$4 sm:$0xff]  }
 0x235   :  { %6680 = vpow2.f32 %v1498_v24  ;;  %3833 = vmatpush1.bf16.msra.mxu1 %v6297_v20  ;;  %3997 = vmatpush1.bf16.msra.mxu0 %v6300_v21 }
 0x236   :  { %3834 = vmatprep.subr.bf16.mxu1 %v6305_v22  ;;  %3998 = vmatprep.subr.bf16.mxu0 %v6308_v23  ;;  %v6339_v22 = vld [vmem:[%s8630_s5 + $0x818] ss:$28 sps:$4 sm:$0xff]   ;;  %v6342_v23 = vld [vmem:[%s8630_s5 + $0x820] ss:$28 sps:$4 sm:$0xff]  }
 0x239   :  { %3835 = vmatpush1.bf16.msra.mxu1 %v6303_v25  ;;  %3999 = vmatpush1.bf16.msra.mxu0 %v6306_v26  ;;  %v6347_v25 = vld [vmem:[%s8630_s5 + $0x854] ss:$28 sps:$4 sm:$0xff]   ;;  %v6350_v26 = vld [vmem:[%s8630_s5 + $0x85c] ss:$28 sps:$4 sm:$0xff]  }
 0x23a   :  { %3845 = vmatprep.subr.bf16.mxu1 %v6311_v28  ;;  %4009 = vmatprep.subr.bf16.mxu0 %v6314_v29  ;;  %v6345_v28 = vld [vmem:[%s8630_s5 + $0x850] ss:$28 sps:$4 sm:$0xff]   ;;  %v6348_v29 = vld [vmem:[%s8630_s5 + $0x858] ss:$28 sps:$4 sm:$0xff]  }
 0x23b   :  { %v6677_v30 = vpop.eup %6676 }
 0x23c   :  { %v6679_v31 = vpop.eup %6678  ;;  %v5213_v32 = vadd.f32 -1.0, %v6677_v30  ;;  %v479_v30 = vsub.s32 4, %v6984_v4 }
 0x23d   :  { %v5214_v33 = vadd.f32 -1.0, %v6679_v31  ;;  %v6353_v31 = vld [vmem:[%s8630_s5 + $0x88c] ss:$28 sps:$4 sm:$0xff]  }
 0x23e   :  { %v1511_v34 = vsel %vm1476_vm7, %v5847_v58, %v5213_v32  ;;  %v6332_v58 = vld [vmem:[%s8630_s5 + $0x7b4] ss:$28 sps:$4 sm:$0xff]  }
 0x23f   :  { %v6681_v35 = vpop.eup %6680  ;;  %v1512_v36 = vsel %vm1477_vm8, %v5848_v61, %v5214_v33  ;;  %v7720_v41 = vpack.c.bf16 %v1511_v34, %v1511_v34  ;;  %v6356_v32 = vld [vmem:[%s8630_s5 + $0x894] ss:$28 sps:$4 sm:$0xff]   ;;  %v6351_v33 = vld [vmem:[%s8630_s5 + $0x888] ss:$28 sps:$4 sm:$0xff]  }
 0x240   :  { %v7712_v44 = vpack.c.bf16 %v1512_v36, %v1512_v36  ;;  %v5216_v37 = vadd.f32 -1.0, %v6681_v35  ;;  %v6354_v34 = vld [vmem:[%s8630_s5 + $0x890] ss:$28 sps:$4 sm:$0xff]   ;;  %v480_v35 = vrot.slane %v7494_v27, %v479_v30  ;;  %v6359_v36 = vld [vmem:[%s8630_s5 + $0x8c4] ss:$28 sps:$4 sm:$0xff]  }
 0x241   :  { %v6360_v27 = vld [vmem:[%s8630_s5 + $0x8c8] ss:$28 sps:$4 sm:$0xff]  }
 0x242   :  { %v1514_v45 = vsel %vm1479_vm9, %v5850_v15, %v5216_v37  ;;  %3836 = vmatprep.mubr.bf16.mxu1 %v7712_v44  ;;  %4000 = vmatprep.mubr.bf16.mxu0 %v7712_v44  ;;  %v6362_v37 = vld [vmem:[%s8630_s5 + $0x8cc] ss:$28 sps:$4 sm:$0xff]  }
 0x243   :  { %v7730_v47 = vpack.c.bf16 %v1514_v45, %v1514_v45  ;;  %3837 = vmatmul.mubr.bf16.vlgmr.msra.gmra.mrb[20].mxu1 %v7720_v41  ;;  %4001 = vmatmul.mubr.bf16.vlgmr.msra.gmra.mrb[12].mxu0 %v7720_v41  ;;  %v6365_v45 = vld [vmem:[%s8630_s5 + $0x8fc] ss:$28 sps:$4 sm:$0xff]  }
 0x244   :  { %3846 = vmatpush1.bf16.msra.mxu1 %v6309_v39  ;;  %4010 = vmatpush1.bf16.msra.mxu0 %v6312_v40  ;;  %v6357_v39 = vld [vmem:[%s8630_s5 + $0x8c0] ss:$28 sps:$4 sm:$0xff]   ;;  %v7837_v40 = vadd.f32 %v7677_v43, %v480_v35 }
 0x245   :  { %3877 = vmatprep.mubr.bf16.mxu1 %v7730_v47  ;;  %4041 = vmatprep.mubr.bf16.mxu0 %v7730_v47  ;;  %v6366_v43 = vld [vmem:[%s8630_s5 + $0x900] ss:$28 sps:$4 sm:$0xff]  }
 0x246   :  { %3847 = vmatprep.subr.bf16.mxu1 %v6317_v46  ;;  %4011 = vmatprep.subr.bf16.mxu0 %v6320_v38  ;;  %v6368_v46 = vld [vmem:[%s8630_s5 + $0x904] ss:$28 sps:$4 sm:$0xff]   ;;  %v6363_v38 = vld [vmem:[%s8630_s5 + $0x8f8] ss:$28 sps:$4 sm:$0xff]   ;;  %vm1478_vm10 = vcmp.gt.f32.partialorder %v7837_v40, 0.0 }
 0x247   :  { %v6416_v35 = vld [vmem:[%s8630_s5 + $0xac4] ss:$28 sps:$4 sm:$0xff]  }
 0x248   :  { %3848 = vmatpush1.bf16.msra.mxu1 %v6315_v48  ;;  %4012 = vmatpush1.bf16.msra.mxu0 %v6318_v50  ;;  %v1485_v48 = vmin.f32 %v7837_v40, 0.0  ;;  %v6371_v50 = vld [vmem:[%s8630_s5 + $0x934] ss:$28 sps:$4 sm:$0xff]  }
 0x249   :  { %3849 = vmatprep.subr.bf16.mxu1 %v6323_v51  ;;  %4013 = vmatprep.subr.bf16.mxu0 %v6326_v52  ;;  %v6374_v51 = vld [vmem:[%s8630_s5 + $0x93c] ss:$28 sps:$4 sm:$0xff]   ;;  %v6369_v52 = vld [vmem:[%s8630_s5 + $0x930] ss:$28 sps:$4 sm:$0xff]  }
 0x24a   :  { %v5655_v60 = vpop.f32.mrb[12].mxu1 }
 0x24b   :  { %v5656_v61 = vpop.f32.mrb[13].mxu1 }
 0x24c   :  { %v5657_v62 = vadd.f32 %v5656_v61, %v5655_v60  ;;  %v5658_v63 = vpop.f32.mrb[14].mxu1  ;;  %3850 = vmatpush1.bf16.msra.mxu1 %v6321_v54  ;;  %4014 = vmatpush1.bf16.msra.mxu0 %v6324_v55  ;;  %v6372_v54 = vld [vmem:[%s8630_s5 + $0x938] ss:$28 sps:$4 sm:$0xff]   ;;  %v1496_v55 = vmul.f32 1.442695, %v1485_v48 }
 0x24d   :  { %v5659_v6 = vpop.f32.mrb[15].mxu1  ;;  %3851 = vmatprep.subr.bf16.mxu1 %v6329_v57  ;;  %4015 = vmatprep.subr.bf16.mxu0 %v6332_v58  ;;  %v6377_v57 = vld [vmem:[%s8630_s5 + $0x96c] ss:$28 sps:$4 sm:$0xff]   ;;  %v6380_v58 = vld [vmem:[%s8630_s5 + $0x974] ss:$28 sps:$4 sm:$0xff]  }
 0x24e   :  { %v1429_v15 = vadd.f32 %v5657_v62, %v488_v10  ;;  %v6375_v60 = vld [vmem:[%s8630_s5 + $0x968] ss:$28 sps:$4 sm:$0xff]   ;;  %v6378_v61 = vld [vmem:[%s8630_s5 + $0x970] ss:$28 sps:$4 sm:$0xff]   ;;  %6682 = vpow2.f32 %v1496_v55  ;;  %v6389_v10 = vld [vmem:[%s8630_s5 + $0x9dc] ss:$28 sps:$4 sm:$0xff]  }
 0x24f   :  { %v6383_v62 = vld [vmem:[%s8630_s5 + $0x9a4] ss:$28 sps:$4 sm:$0xff]   ;;  %v6386_v63 = vld [vmem:[%s8630_s5 + $0x9ac] ss:$28 sps:$4 sm:$0xff]  }
 0x250   :  { %3852 = vmatpush1.bf16.msra.mxu1 %v6327_v0  ;;  %4016 = vmatpush1.bf16.msra.mxu0 %v6330_v2  ;;  %v6381_v0 = vld [vmem:[%s8630_s5 + $0x9a0] ss:$28 sps:$4 sm:$0xff]   ;;  %v6384_v2 = vld [vmem:[%s8630_s5 + $0x9a8] ss:$28 sps:$4 sm:$0xff]  }
 0x251   :  { %3853 = vmatprep.subr.bf16.mxu1 %v6335_v11  ;;  %4017 = vmatprep.subr.bf16.mxu0 %v6338_v12  ;;  %v6392_v11 = vld [vmem:[%s8630_s5 + $0x9e4] ss:$28 sps:$4 sm:$0xff]   ;;  %v6387_v12 = vld [vmem:[%s8630_s5 + $0x9d8] ss:$28 sps:$4 sm:$0xff]  }
 0x252   :  { %v1468_v18 = vpop.f32.mrb[16].mxu1  ;;  %v6430_v55 = vld [vmem:[%s8630_s5 + $0x248] ss:$28 sps:$4 sm:$0xff]  }
 0x253   :  { %v7788_v19 = vadd.f32 %v1468_v18, %v1429_v15  ;;  %v5827_v20 = vpop.f32.mrb[17].mxu1  ;;  %v6395_v15 = vld [vmem:[%s8630_s5 + $0xa14] ss:$28 sps:$4 sm:$0xff]  }
 0x254   :  { %v1471_v21 = vpop.f32.mrb[18].mxu1  ;;  %3854 = vmatpush1.bf16.msra.mxu1 %v6333_v13  ;;  %4018 = vmatpush1.bf16.msra.mxu0 %v6336_v14  ;;  %v6390_v13 = vld [vmem:[%s8630_s5 + $0x9e0] ss:$28 sps:$4 sm:$0xff]   ;;  %v6393_v18 = vld [vmem:[%s8630_s5 + $0xa10] ss:$28 sps:$4 sm:$0xff]  }
 0x255   :  { %v5828_v24 = vpop.f32.mrb[19].mxu1  ;;  %3855 = vmatprep.subr.bf16.mxu1 %v6341_v16  ;;  %4019 = vmatprep.subr.bf16.mxu0 %v6344_v17  ;;  %v1487_v6 = vmin.f32 %v7788_v19, 0.0  ;;  %v6398_v16 = vld [vmem:[%s8630_s5 + $0xa1c] ss:$28 sps:$4 sm:$0xff]   ;;  %v6401_v21 = vld [vmem:[%s8630_s5 + $0xa4c] ss:$28 sps:$4 sm:$0xff]  }
 0x256   :  { %v6396_v20 = vld [vmem:[%s8630_s5 + $0xa18] ss:$28 sps:$4 sm:$0xff]   ;;  %v6399_v24 = vld [vmem:[%s8630_s5 + $0xa48] ss:$28 sps:$4 sm:$0xff]   ;;  %vm1480_vm11 = vcmp.gt.f32.partialorder %v7788_v19, 0.0 }
 0x257   :  { %v1500_v14 = vmul.f32 1.442695, %v1487_v6  ;;  %v6441_v6 = vld [vmem:[%s8630_s5 + $0xf8] ss:$28 sps:$4 sm:$0xff]  }
 0x258   :  { %3856 = vmatpush1.bf16.msra.mxu1 %v6339_v22  ;;  %4020 = vmatpush1.bf16.msra.mxu0 %v6342_v23  ;;  %v6683_v17 = vpop.eup %6682  ;;  %v6404_v22 = vld [vmem:[%s8630_s5 + $0xa54] ss:$28 sps:$4 sm:$0xff]  }
 0x259   :  { %3857 = vmatprep.subr.bf16.mxu1 %v6347_v25  ;;  %4021 = vmatprep.subr.bf16.mxu0 %v6350_v26  ;;  %6684 = vpow2.f32 %v1500_v14  ;;  %v5215_v23 = vadd.f32 -1.0, %v6683_v17  ;;  %v6402_v25 = vld [vmem:[%s8630_s5 + $0xa50] ss:$28 sps:$4 sm:$0xff]   ;;  %v6407_v26 = vld [vmem:[%s8630_s5 + $0xa84] ss:$28 sps:$4 sm:$0xff]  }
 0x25a   :  { %v6449_v14 = vld [vmem:[%s8630_s5 + $0x164] ss:$28 sps:$4 sm:$0xff]  }
 0x25b   :  { %v6451_v17 = vld [vmem:[%s8630_s5 + $0x168] ss:$28 sps:$4 sm:$0xff]  }
 0x25c   :  { %3858 = vmatpush1.bf16.msra.mxu1 %v6345_v28  ;;  %4022 = vmatpush1.bf16.msra.mxu0 %v6348_v29  ;;  %v6410_v28 = vld [vmem:[%s8630_s5 + $0xa8c] ss:$28 sps:$4 sm:$0xff]   ;;  %v1513_v29 = vsel %vm1478_vm10, %v7837_v40, %v5215_v23  ;;  %v6420_v40 = vld [vmem:[%s8630_s5 + $0x1d8] ss:$28 sps:$4 sm:$0xff]  }
 0x25d   :  { %3859 = vmatprep.subr.bf16.mxu1 %v6353_v31  ;;  %4023 = vmatprep.subr.bf16.mxu0 %v6356_v32  ;;  %v6405_v31 = vld [vmem:[%s8630_s5 + $0xa80] ss:$28 sps:$4 sm:$0xff]   ;;  %v6408_v32 = vld [vmem:[%s8630_s5 + $0xa88] ss:$28 sps:$4 sm:$0xff]   ;;  %v6459_v23 = vld [vmem:[%s8630_s5 + $0x1d4] ss:$28 sps:$4 sm:$0xff]  }
 0x260   :  { %3860 = vmatpush1.bf16.msra.mxu1 %v6351_v33  ;;  %4024 = vmatpush1.bf16.msra.mxu0 %v6354_v34  ;;  %v7939_v33 = vpack.c.bf16 %v1513_v29, %v1513_v29  ;;  %v6413_v34 = vld [vmem:[%s8630_s5 + $0xabc] ss:$28 sps:$4 sm:$0xff]   ;;  %v6465_v29 = vld [vmem:[%s8630_s5 + $0x590] ss:$28 sps:$4 sm:$0xff]  }
 0x261   :  { %3861 = vmatprep.subr.bf16.mxu1 %v6359_v36  ;;  %4025 = vmatprep.subr.bf16.mxu0 %v6362_v37  ;;  %v6411_v37 = vld [vmem:[%s8630_s5 + $0xab8] ss:$28 sps:$4 sm:$0xff]  }
 0x263   :  { %v6685_v36 = vpop.eup %6684 }
 0x264   :  { %3862 = vmatpush1.bf16.msra.mxu1 %v6357_v39  ;;  %4026 = vmatpush1.bf16.msra.mxu0 %v6360_v27  ;;  %v6414_v39 = vld [vmem:[%s8630_s5 + $0xac0] ss:$28 sps:$4 sm:$0xff]   ;;  %v6419_v27 = vld [vmem:[%s8630_s5 + $0x14] ss:$28 sps:$4 sm:$0xff]  }
 0x265   :  { %3863 = vmatprep.subr.bf16.mxu1 %v6365_v45  ;;  %4027 = vmatprep.subr.bf16.mxu0 %v6368_v46  ;;  %v5217_v45 = vadd.f32 -1.0, %v6685_v36  ;;  %v6467_v36 = vld [vmem:[%s8630_s5 + $0x240] ss:$28 sps:$4 sm:$0xff]  }
 0x267   :  { %v1515_v46 = vsel %vm1480_vm11, %v7788_v19, %v5217_v45  ;;  %v6422_v19 = vld [vmem:[%s8630_s5 + $0x48] ss:$28 sps:$4 sm:$0xff]   ;;  %v6476_v45 = vld [vmem:[%s8630_s5 + $0x440] ss:$28 sps:$4 sm:$0xff]  }
 0x268   :  { %3864 = vmatpush1.bf16.msra.mxu1 %v6363_v38  ;;  %4028 = vmatpush1.bf16.msra.mxu0 %v6366_v43  ;;  %v6417_v38 = vld [vmem:[%s8630_s5 + $0x10] ss:$28 sps:$4 sm:$0xff]   ;;  %v6421_v43 = vld [vmem:[%s8630_s5 + $0x18] ss:$28 sps:$4 sm:$0xff]   ;;  %v7971_v48 = vpack.c.bf16 %v1515_v46, %v1515_v46 }
 0x269   :  { %3865 = vmatprep.subr.bf16.mxu1 %v6371_v50  ;;  %4029 = vmatprep.subr.bf16.mxu0 %v6374_v51  ;;  %v6424_v50 = vld [vmem:[%s8630_s5 + $0x4c] ss:$28 sps:$4 sm:$0xff]   ;;  %v6479_v46 = vld [vmem:[%s8630_s5 + $0x2b4] ss:$28 sps:$4 sm:$0xff]  }
 0x26a   :  { %v6425_v51 = vld [vmem:[%s8630_s5 + $0x210] ss:$28 sps:$4 sm:$0xff]  }
 0x26c   :  { %3866 = vmatpush1.bf16.msra.mxu1 %v6369_v52  ;;  %4030 = vmatpush1.bf16.msra.mxu0 %v6372_v54  ;;  %v6426_v52 = vld [vmem:[%s8630_s5 + $0x50] ss:$28 sps:$4 sm:$0xff]   ;;  %v6429_v54 = vld [vmem:[%s8630_s5 + $0x84] ss:$28 sps:$4 sm:$0xff]  }
 0x26d   :  { %3867 = vmatprep.subr.bf16.mxu1 %v6377_v57  ;;  %4031 = vmatprep.subr.bf16.mxu0 %v6380_v58  ;;  %v6427_v57 = vld [vmem:[%s8630_s5 + $0x80] ss:$28 sps:$4 sm:$0xff]  }
 0x26e   :  { %v6434_v58 = vld [vmem:[%s8630_s5 + $0xbc] ss:$28 sps:$4 sm:$0xff]  }
 0x270   :  { %3868 = vmatpush1.bf16.msra.mxu1 %v6375_v60  ;;  %4032 = vmatpush1.bf16.msra.mxu0 %v6378_v61  ;;  %v6435_v60 = vld [vmem:[%s8630_s5 + $0x280] ss:$28 sps:$4 sm:$0xff]   ;;  %v6432_v61 = vld [vmem:[%s8630_s5 + $0xb8] ss:$28 sps:$4 sm:$0xff]  }
 0x271   :  { %3869 = vmatprep.subr.bf16.mxu1 %v6383_v62  ;;  %4033 = vmatprep.subr.bf16.mxu0 %v6386_v63  ;;  %v6436_v62 = vld [vmem:[%s8630_s5 + $0xc0] ss:$28 sps:$4 sm:$0xff]   ;;  %v6439_v63 = vld [vmem:[%s8630_s5 + $0xf4] ss:$28 sps:$4 sm:$0xff]  }
 0x274   :  { %3870 = vmatpush1.bf16.msra.mxu1 %v6381_v0  ;;  %4034 = vmatpush1.bf16.msra.mxu0 %v6384_v2  ;;  %v6440_v0 = vld [vmem:[%s8630_s5 + $0x2b8] ss:$28 sps:$4 sm:$0xff]   ;;  %v6437_v2 = vld [vmem:[%s8630_s5 + $0xf0] ss:$28 sps:$4 sm:$0xff]  }
 0x275   :  { %3871 = vmatprep.subr.bf16.mxu1 %v6389_v10  ;;  %4035 = vmatprep.subr.bf16.mxu0 %v6392_v11  ;;  %v6444_v10 = vld [vmem:[%s8630_s5 + $0x12c] ss:$28 sps:$4 sm:$0xff]  }
 0x276   :  { %v6445_v11 = vld [vmem:[%s8630_s5 + $0x2f0] ss:$28 sps:$4 sm:$0xff]  }
 0x278   :  { %3872 = vmatpush1.bf16.msra.mxu1 %v6387_v12  ;;  %4036 = vmatpush1.bf16.msra.mxu0 %v6390_v13  ;;  %v6442_v12 = vld [vmem:[%s8630_s5 + $0x128] ss:$28 sps:$4 sm:$0xff]   ;;  %v6446_v13 = vld [vmem:[%s8630_s5 + $0x130] ss:$28 sps:$4 sm:$0xff]  }
 0x279   :  { %3873 = vmatprep.subr.bf16.mxu1 %v6395_v15  ;;  %4037 = vmatprep.subr.bf16.mxu0 %v6398_v16  ;;  %v6450_v15 = vld [vmem:[%s8630_s5 + $0x328] ss:$28 sps:$4 sm:$0xff]   ;;  %v6447_v16 = vld [vmem:[%s8630_s5 + $0x160] ss:$28 sps:$4 sm:$0xff]  }
 0x27c   :  { %3874 = vmatpush1.bf16.msra.mxu1 %v6393_v18  ;;  %4038 = vmatpush1.bf16.msra.mxu0 %v6396_v20  ;;  %v6454_v18 = vld [vmem:[%s8630_s5 + $0x19c] ss:$28 sps:$4 sm:$0xff]  }
 0x27d   :  { %3875 = vmatprep.subr.bf16.mxu1 %v6401_v21  ;;  %4039 = vmatprep.subr.bf16.mxu0 %v6404_v22  ;;  %v6455_v20 = vld [vmem:[%s8630_s5 + $0x360] ss:$28 sps:$4 sm:$0xff]   ;;  %v6452_v21 = vld [vmem:[%s8630_s5 + $0x198] ss:$28 sps:$4 sm:$0xff]  }
 0x27e   :  { %v6456_v22 = vld [vmem:[%s8630_s5 + $0x1a0] ss:$28 sps:$4 sm:$0xff]  }
 0x280   :  { %3876 = vmatpush1.bf16.msra.mxu1 %v6399_v24  ;;  %4040 = vmatpush1.bf16.msra.mxu0 %v6402_v25  ;;  %v6460_v24 = vld [vmem:[%s8630_s5 + $0x558] ss:$28 sps:$4 sm:$0xff]   ;;  %v6457_v25 = vld [vmem:[%s8630_s5 + $0x1d0] ss:$28 sps:$4 sm:$0xff]  }
 0x281   :  { %3886 = vmatprep.subr.bf16.mxu1 %v6407_v26  ;;  %4050 = vmatprep.subr.bf16.mxu0 %v6410_v28  ;;  %v6461_v26 = vld [vmem:[%s8630_s5 + $0x398] ss:$28 sps:$4 sm:$0xff]   ;;  %v6464_v28 = vld [vmem:[%s8630_s5 + $0x20c] ss:$28 sps:$4 sm:$0xff]  }
 0x283   :  { %3878 = vmatmul.mubr.bf16.vlgmr.msra.gmra.mrb[20].mxu1 %v7939_v33  ;;  %4042 = vmatmul.mubr.bf16.vlgmr.msra.gmra.mrb[12].mxu0 %v7939_v33 }
 0x284   :  { %3887 = vmatpush1.bf16.msra.mxu1 %v6405_v31  ;;  %4051 = vmatpush1.bf16.msra.mxu0 %v6408_v32  ;;  %v6462_v31 = vld [vmem:[%s8630_s5 + $0x208] ss:$28 sps:$4 sm:$0xff]   ;;  %v6466_v32 = vld [vmem:[%s8630_s5 + $0x3d0] ss:$28 sps:$4 sm:$0xff]  }
 0x285   :  { %3888 = vmatprep.subr.bf16.mxu1 %v6413_v34  ;;  %4052 = vmatprep.subr.bf16.mxu0 %v6416_v35  ;;  %v6469_v34 = vld [vmem:[%s8630_s5 + $0x244] ss:$28 sps:$4 sm:$0xff]  }
 0x286   :  { %3918 = vmatprep.mubr.bf16.mxu1 %v6730_v5  ;;  %4082 = vmatprep.mubr.bf16.mxu0 %v6730_v5  ;;  %v6470_v35 = vld [vmem:[%s8630_s5 + $0x5c8] ss:$28 sps:$4 sm:$0xff]  }
 0x288   :  { %3889 = vmatpush1.bf16.msra.mxu1 %v6411_v37  ;;  %4053 = vmatpush1.bf16.msra.mxu0 %v6414_v39  ;;  %v6471_v37 = vld [vmem:[%s8630_s5 + $0x408] ss:$28 sps:$4 sm:$0xff]   ;;  %v6474_v39 = vld [vmem:[%s8630_s5 + $0x27c] ss:$28 sps:$4 sm:$0xff]  }
 0x289   :  { %4091 = vmatprep.subr.bf16.mxu1 %v6419_v27  ;;  %5664 = vmatprep.subr.bf16.mxu0 %v6420_v40  ;;  %v6475_v27 = vld [vmem:[%s8630_s5 + $0x600] ss:$28 sps:$4 sm:$0xff]   ;;  %v6472_v40 = vld [vmem:[%s8630_s5 + $0x278] ss:$28 sps:$4 sm:$0xff]  }
 0x28f   :  { %5568 = vmatmul.mubr.msk.bf16.vlgmr.msra.gmra.mrb[20].mxu1 %vm1144_vm3, %v7971_v48  ;;  %5569 = vmatmul.mubr.msk.bf16.vlgmr.msra.gmra.mrb[12].mxu0 %vm1144_vm3, %v7971_v48 }
 0x290   :  { %4092 = vmatpush1.bf16.msra.mxu1 %v6417_v38  ;;  %5665 = vmatpush3.bf16.msra.mxu0 %v6421_v43  ;;  %v6480_v38 = vld [vmem:[%s8630_s5 + $0x638] ss:$28 sps:$4 sm:$0xff]   ;;  %v6477_v43 = vld [vmem:[%s8630_s5 + $0x2b0] ss:$28 sps:$4 sm:$0xff]  }
 0x291   :  { %4123 = vmatprep.mubr.bf16.mxu1 %v7500_v53  ;;  %4287 = vmatprep.mubr.bf16.mxu0 %v7500_v53  ;;  %v6431_v53 = vld [vmem:[%s8630_s5 + $0x88] ss:$28 sps:$4 sm:$0xff]  }
 0x292   :  { %4093 = vmatprep.subr.bf16.mxu1 %v6424_v50  ;;  %5666 = vmatprep.subr.bf16.mxu0 %v6425_v51  ;;  %v6481_v50 = vld [vmem:[%s8630_s5 + $0x478] ss:$28 sps:$4 sm:$0xff]   ;;  %v6484_v51 = vld [vmem:[%s8630_s5 + $0x2ec] ss:$28 sps:$4 sm:$0xff]  }
 0x294   :  { %4094 = vmatpush1.bf16.msra.mxu1 %v6422_v19  ;;  %5667 = vmatpush3.bf16.msra.mxu0 %v6426_v52  ;;  %v6485_v19 = vld [vmem:[%s8630_s5 + $0x670] ss:$28 sps:$4 sm:$0xff]   ;;  %v6482_v52 = vld [vmem:[%s8630_s5 + $0x2e8] ss:$28 sps:$4 sm:$0xff]  }
 0x295   :  { %4095 = vmatprep.subr.bf16.mxu1 %v6429_v54  ;;  %5668 = vmatprep.subr.bf16.mxu0 %v6430_v55  ;;  %v6486_v54 = vld [vmem:[%s8630_s5 + $0x4b0] ss:$28 sps:$4 sm:$0xff]   ;;  %v6489_v55 = vld [vmem:[%s8630_s5 + $0x324] ss:$28 sps:$4 sm:$0xff]  }
 0x298   :  { %4096 = vmatpush1.bf16.msra.mxu1 %v6427_v57  ;;  %5669 = vmatpush3.bf16.msra.mxu0 %v6431_v53  ;;  %v6490_v57 = vld [vmem:[%s8630_s5 + $0x6a8] ss:$28 sps:$4 sm:$0xff]   ;;  %v6487_v53 = vld [vmem:[%s8630_s5 + $0x320] ss:$28 sps:$4 sm:$0xff]  }
 0x299   :  { %4097 = vmatprep.subr.bf16.mxu1 %v6434_v58  ;;  %5670 = vmatprep.subr.bf16.mxu0 %v6435_v60  ;;  %v6491_v58 = vld [vmem:[%s8630_s5 + $0x4e8] ss:$28 sps:$4 sm:$0xff]   ;;  %v6494_v60 = vld [vmem:[%s8630_s5 + $0x35c] ss:$28 sps:$4 sm:$0xff]  }
 0x29c   :  { %4098 = vmatpush1.bf16.msra.mxu1 %v6432_v61  ;;  %5671 = vmatpush3.bf16.msra.mxu0 %v6436_v62  ;;  %v6495_v61 = vld [vmem:[%s8630_s5 + $0x6e0] ss:$28 sps:$4 sm:$0xff]   ;;  %v6492_v62 = vld [vmem:[%s8630_s5 + $0x358] ss:$28 sps:$4 sm:$0xff]  }
 0x29d   :  { %4099 = vmatprep.subr.bf16.mxu1 %v6439_v63  ;;  %5672 = vmatprep.subr.bf16.mxu0 %v6440_v0  ;;  %v6496_v63 = vld [vmem:[%s8630_s5 + $0x520] ss:$28 sps:$4 sm:$0xff]   ;;  %v6499_v0 = vld [vmem:[%s8630_s5 + $0x394] ss:$28 sps:$4 sm:$0xff]  }
 0x2a0   :  { %4100 = vmatpush1.bf16.msra.mxu1 %v6437_v2  ;;  %5673 = vmatpush3.bf16.msra.mxu0 %v6441_v6  ;;  %v6500_v2 = vld [vmem:[%s8630_s5 + $0x8d8] ss:$28 sps:$4 sm:$0xff]   ;;  %v6497_v6 = vld [vmem:[%s8630_s5 + $0x390] ss:$28 sps:$4 sm:$0xff]  }
 0x2a1   :  { %4101 = vmatprep.subr.bf16.mxu1 %v6444_v10  ;;  %5674 = vmatprep.subr.bf16.mxu0 %v6445_v11  ;;  %v6501_v10 = vld [vmem:[%s8630_s5 + $0x718] ss:$28 sps:$4 sm:$0xff]   ;;  %v6504_v11 = vld [vmem:[%s8630_s5 + $0x3cc] ss:$28 sps:$4 sm:$0xff]  }
 0x2a4   :  { %4102 = vmatpush1.bf16.msra.mxu1 %v6442_v12  ;;  %5675 = vmatpush3.bf16.msra.mxu0 %v6446_v13  ;;  %v6505_v12 = vld [vmem:[%s8630_s5 + $0x910] ss:$28 sps:$4 sm:$0xff]   ;;  %v6502_v13 = vld [vmem:[%s8630_s5 + $0x3c8] ss:$28 sps:$4 sm:$0xff]  }
 0x2a5   :  { %4103 = vmatprep.subr.bf16.mxu1 %v6449_v14  ;;  %5676 = vmatprep.subr.bf16.mxu0 %v6450_v15  ;;  %v6506_v14 = vld [vmem:[%s8630_s5 + $0x750] ss:$28 sps:$4 sm:$0xff]   ;;  %v6507_v15 = vld [vmem:[%s8630_s5 + $0x400] ss:$28 sps:$4 sm:$0xff]  }
 0x2a8   :  { %4104 = vmatpush1.bf16.msra.mxu1 %v6447_v16  ;;  %5677 = vmatpush3.bf16.msra.mxu0 %v6451_v17  ;;  %v6511_v16 = vld [vmem:[%s8630_s5 + $0x788] ss:$28 sps:$4 sm:$0xff]   ;;  %v6514_v17 = vld [vmem:[%s8630_s5 + $0x43c] ss:$28 sps:$4 sm:$0xff]  }
 0x2a9   :  { %4105 = vmatprep.subr.bf16.mxu1 %v6454_v18  ;;  %5678 = vmatprep.subr.bf16.mxu0 %v6455_v20  ;;  %v6515_v18 = vld [vmem:[%s8630_s5 + $0x980] ss:$28 sps:$4 sm:$0xff]   ;;  %v6512_v20 = vld [vmem:[%s8630_s5 + $0x438] ss:$28 sps:$4 sm:$0xff]  }
 0x2ac   :  { %4106 = vmatpush1.bf16.msra.mxu1 %v6452_v21  ;;  %5679 = vmatpush3.bf16.msra.mxu0 %v6456_v22  ;;  %v6516_v21 = vld [vmem:[%s8630_s5 + $0x7c0] ss:$28 sps:$4 sm:$0xff]   ;;  %v6519_v22 = vld [vmem:[%s8630_s5 + $0x474] ss:$28 sps:$4 sm:$0xff]  }
 0x2ad   :  { %4107 = vmatprep.subr.bf16.mxu1 %v6459_v23  ;;  %5686 = vmatprep.subr.bf16.mxu0 %v6460_v24  ;;  %v6520_v23 = vld [vmem:[%s8630_s5 + $0x9b8] ss:$28 sps:$4 sm:$0xff]   ;;  %v6517_v24 = vld [vmem:[%s8630_s5 + $0x470] ss:$28 sps:$4 sm:$0xff]  }
 0x2af   :  { %4288 = vmatmul.mubr.bf16.vlgmr.msra.gmra.mrb[16].mxu0 %v7508_v56 }
 0x2b0   :  { %4108 = vmatpush1.bf16.msra.mxu1 %v6457_v25  ;;  %5687 = vmatpush3.bf16.msra.mxu0 %v6461_v26  ;;  %v6521_v25 = vld [vmem:[%s8630_s5 + $0x7f8] ss:$28 sps:$4 sm:$0xff]   ;;  %v6524_v26 = vld [vmem:[%s8630_s5 + $0x4ac] ss:$28 sps:$4 sm:$0xff]  }
 0x2b1   :  { %4327 = vmatprep.mubr.bf16.mxu0 %v7712_v44  ;;  %4109 = vmatprep.subr.bf16.mxu1 %v6464_v28  ;;  %v6525_v28 = vld [vmem:[%s8630_s5 + $0x9f0] ss:$28 sps:$4 sm:$0xff]  }
 0x2b2   :  { %5688 = vmatprep.subr.bf16.mxu0 %v6465_v29  ;;  %v6522_v29 = vld [vmem:[%s8630_s5 + $0x4a8] ss:$28 sps:$4 sm:$0xff]  }
 0x2b4   :  { %4110 = vmatpush1.bf16.msra.mxu1 %v6462_v31  ;;  %5689 = vmatpush3.bf16.msra.mxu0 %v6466_v32  ;;  %v6526_v31 = vld [vmem:[%s8630_s5 + $0x830] ss:$28 sps:$4 sm:$0xff]   ;;  %v6529_v32 = vld [vmem:[%s8630_s5 + $0x4e4] ss:$28 sps:$4 sm:$0xff]  }
 0x2b5   :  { %4111 = vmatprep.subr.bf16.mxu1 %v6469_v34  ;;  %5690 = vmatprep.subr.bf16.mxu0 %v6470_v35  ;;  %v6530_v34 = vld [vmem:[%s8630_s5 + $0xa28] ss:$28 sps:$4 sm:$0xff]   ;;  %v6527_v35 = vld [vmem:[%s8630_s5 + $0x4e0] ss:$28 sps:$4 sm:$0xff]  }
 0x2b8   :  { %4112 = vmatpush1.bf16.msra.mxu1 %v6467_v36  ;;  %5691 = vmatpush3.bf16.msra.mxu0 %v6471_v37  ;;  %v6531_v36 = vld [vmem:[%s8630_s5 + $0x868] ss:$28 sps:$4 sm:$0xff]   ;;  %v6534_v37 = vld [vmem:[%s8630_s5 + $0x51c] ss:$28 sps:$4 sm:$0xff]  }
 0x2b9   :  { %4113 = vmatprep.subr.bf16.mxu1 %v6474_v39  ;;  %5692 = vmatprep.subr.bf16.mxu0 %v6475_v27  ;;  %v6535_v39 = vld [vmem:[%s8630_s5 + $0xa60] ss:$28 sps:$4 sm:$0xff]   ;;  %v6532_v27 = vld [vmem:[%s8630_s5 + $0x518] ss:$28 sps:$4 sm:$0xff]  }
 0x2bc   :  { %4114 = vmatpush1.bf16.msra.mxu1 %v6472_v40  ;;  %5693 = vmatpush3.bf16.msra.mxu0 %v6476_v45  ;;  %v6536_v40 = vld [vmem:[%s8630_s5 + $0x8a0] ss:$28 sps:$4 sm:$0xff]   ;;  %v6539_v45 = vld [vmem:[%s8630_s5 + $0x554] ss:$28 sps:$4 sm:$0xff]  }
 0x2bd   :  { %4115 = vmatprep.subr.bf16.mxu1 %v6479_v46  ;;  %5694 = vmatprep.subr.bf16.mxu0 %v6480_v38  ;;  %v6537_v46 = vld [vmem:[%s8630_s5 + $0x550] ss:$28 sps:$4 sm:$0xff]   ;;  %v6540_v38 = vld [vmem:[%s8630_s5 + $0xa98] ss:$28 sps:$4 sm:$0xff]  }
 0x2c0   :  { %4116 = vmatpush1.bf16.msra.mxu1 %v6477_v43  ;;  %5695 = vmatpush3.bf16.msra.mxu0 %v6481_v50  ;;  %v6543_v43 = vld [vmem:[%s8630_s5 + $0x58c] ss:$28 sps:$4 sm:$0xff]  }
 0x2c1   :  { %4117 = vmatprep.subr.bf16.mxu1 %v6484_v51  ;;  %5696 = vmatprep.subr.bf16.mxu0 %v6485_v19  ;;  %v6541_v50 = vld [vmem:[%s8630_s5 + $0x588] ss:$28 sps:$4 sm:$0xff]   ;;  %v6544_v51 = vld [vmem:[%s8630_s5 + $0xad0] ss:$28 sps:$4 sm:$0xff]  }
 0x2c2   :  { %v6547_v19 = vld [vmem:[%s8630_s5 + $0x5c4] ss:$28 sps:$4 sm:$0xff]  }
 0x2c4   :  { %4118 = vmatpush1.bf16.msra.mxu1 %v6482_v52  ;;  %5697 = vmatpush3.bf16.msra.mxu0 %v6486_v54  ;;  %v6617_v52 = vld [vmem:[%s8632_s7 + $0x40] sm:$0xff]  }
 0x2c5   :  { %4119 = vmatprep.subr.bf16.mxu1 %v6489_v55  ;;  %5698 = vmatprep.subr.bf16.mxu0 %v6490_v57  ;;  %v6545_v54 = vld [vmem:[%s8630_s5 + $0x5c0] ss:$28 sps:$4 sm:$0xff]  }
 0x2c6   :  { %v6550_v55 = vld [vmem:[%s8630_s5 + $0x5fc] ss:$28 sps:$4 sm:$0xff]   ;;  %v6618_v57 = vld [vmem:[%s8632_s7] sm:$0xff]  }
 0x2c8   :  { %4120 = vmatpush1.bf16.msra.mxu1 %v6487_v53  ;;  %5699 = vmatpush3.bf16.msra.mxu0 %v6491_v58  ;;  %v6619_v53 = vld [vmem:[%s8632_s7 + $0x48] sm:$0xff]   ;;  %v6548_v58 = vld [vmem:[%s8630_s5 + $0x5f8] ss:$28 sps:$4 sm:$0xff]  }
 0x2c9   :  { %4121 = vmatprep.subr.bf16.mxu1 %v6494_v60  ;;  %5700 = vmatprep.subr.bf16.mxu0 %v6495_v61  ;;  %v6553_v60 = vld [vmem:[%s8630_s5 + $0x634] ss:$28 sps:$4 sm:$0xff]   ;;  %v6620_v61 = vld [vmem:[%s8632_s7 + $0x8] sm:$0xff]  }
 0x2cc   :  { %4122 = vmatpush1.bf16.msra.mxu1 %v6492_v62  ;;  %5701 = vmatpush3.bf16.msra.mxu0 %v6496_v63  ;;  %v6621_v62 = vld [vmem:[%s8632_s7 + $0x50] sm:$0xff]  }
 0x2cd   :  { %4132 = vmatprep.subr.bf16.mxu1 %v6499_v0  ;;  %5708 = vmatprep.subr.bf16.mxu0 %v6500_v2  ;;  %v6551_v63 = vld [vmem:[%s8630_s5 + $0x630] ss:$28 sps:$4 sm:$0xff]  }
 0x2ce   :  { %v6556_v0 = vld [vmem:[%s8630_s5 + $0x66c] ss:$28 sps:$4 sm:$0xff]   ;;  %v6622_v2 = vld [vmem:[%s8632_s7 + $0x10] sm:$0xff]  }
 0x2cf   :  { %4124 = vmatmul.mubr.bf16.vlgmr.msra.gmra.mrb[24].mxu1 %v7508_v56  ;;  %4328 = vmatmul.mubr.bf16.vlgmr.msra.gmra.mrb[20].mxu0 %v7720_v41  ;;  %v6509_v56 = vld [vmem:[%s8630_s5 + $0x404] ss:$28 sps:$4 sm:$0xff]  }
 0x2d0   :  { %4133 = vmatpush1.bf16.msra.mxu1 %v6497_v6  ;;  %4164 = vmatprep.mubr.bf16.mxu1 %v7712_v44  ;;  %v6510_v44 = vld [vmem:[%s8630_s5 + $0x948] ss:$28 sps:$4 sm:$0xff]   ;;  %v6623_v6 = vld [vmem:[%s8632_s7 + $0x58] sm:$0xff]  }
 0x2d1   :  { %5709 = vmatpush3.bf16.msra.mxu0 %v6501_v10  ;;  %4367 = vmatprep.mubr.bf16.mxu0 %v7730_v47  ;;  %v6554_v10 = vld [vmem:[%s8630_s5 + $0x668] ss:$28 sps:$4 sm:$0xff]  }
 0x2d2   :  { %4134 = vmatprep.subr.bf16.mxu1 %v6504_v11  ;;  %5710 = vmatprep.subr.bf16.mxu0 %v6505_v12  ;;  %v6559_v11 = vld [vmem:[%s8630_s5 + $0x6a4] ss:$28 sps:$4 sm:$0xff]   ;;  %v6624_v12 = vld [vmem:[%s8632_s7 + $0x18] sm:$0xff]  }
 0x2d4   :  { %4135 = vmatpush1.bf16.msra.mxu1 %v6502_v13  ;;  %v6625_v13 = vld [vmem:[%s8632_s7 + $0x60] sm:$0xff]  }
 0x2d5   :  { %5711 = vmatpush3.bf16.msra.mxu0 %v6506_v14  ;;  %4136 = vmatprep.subr.bf16.mxu1 %v6509_v56  ;;  %v6557_v14 = vld [vmem:[%s8630_s5 + $0x6a0] ss:$28 sps:$4 sm:$0xff]  }
 0x2d6   :  { %5712 = vmatprep.subr.bf16.mxu0 %v6510_v44  ;;  %v6562_v56 = vld [vmem:[%s8630_s5 + $0x6dc] ss:$28 sps:$4 sm:$0xff]   ;;  %v6626_v44 = vld [vmem:[%s8632_s7 + $0x20] sm:$0xff]  }
 0x2d8   :  { %4137 = vmatpush1.bf16.msra.mxu1 %v6507_v15  ;;  %v6627_v15 = vld [vmem:[%s8632_s7 + $0x68] sm:$0xff]  }
 0x2d9   :  { %5713 = vmatpush3.bf16.msra.mxu0 %v6511_v16  ;;  %4138 = vmatprep.subr.bf16.mxu1 %v6514_v17  ;;  %v6560_v16 = vld [vmem:[%s8630_s5 + $0x6d8] ss:$28 sps:$4 sm:$0xff]  }
 0x2da   :  { %5714 = vmatprep.subr.bf16.mxu0 %v6515_v18  ;;  %v6565_v17 = vld [vmem:[%s8630_s5 + $0x714] ss:$28 sps:$4 sm:$0xff]   ;;  %v6628_v18 = vld [vmem:[%s8632_s7 + $0x28] sm:$0xff]  }
 0x2dc   :  { %4139 = vmatpush1.bf16.msra.mxu1 %v6512_v20  ;;  %v6629_v20 = vld [vmem:[%s8632_s7 + $0x70] sm:$0xff]  }
 0x2dd   :  { %5715 = vmatpush3.bf16.msra.mxu0 %v6516_v21  ;;  %4140 = vmatprep.subr.bf16.mxu1 %v6519_v22  ;;  %v6563_v21 = vld [vmem:[%s8630_s5 + $0x710] ss:$28 sps:$4 sm:$0xff]  }
 0x2de   :  { %5716 = vmatprep.subr.bf16.mxu0 %v6520_v23  ;;  %v6568_v22 = vld [vmem:[%s8630_s5 + $0x74c] ss:$28 sps:$4 sm:$0xff]   ;;  %v6630_v23 = vld [vmem:[%s8632_s7 + $0x30] sm:$0xff]  }
 0x2e0   :  { %4141 = vmatpush1.bf16.msra.mxu1 %v6517_v24  ;;  %v6631_v24 = vld [vmem:[%s8632_s7 + $0x78] sm:$0xff]  }
 0x2e1   :  { %5717 = vmatpush3.bf16.msra.mxu0 %v6521_v25  ;;  %4142 = vmatprep.subr.bf16.mxu1 %v6524_v26  ;;  %v6566_v25 = vld [vmem:[%s8630_s5 + $0x748] ss:$28 sps:$4 sm:$0xff]  }
 0x2e2   :  { %5718 = vmatprep.subr.bf16.mxu0 %v6525_v28  ;;  %v6571_v26 = vld [vmem:[%s8630_s5 + $0x784] ss:$28 sps:$4 sm:$0xff]   ;;  %v6632_v28 = vld [vmem:[%s8632_s7 + $0x38] sm:$0xff]  }
 0x2e4   :  { %4143 = vmatpush1.bf16.msra.mxu1 %v6522_v29  ;;  %v6574_v29 = vld [vmem:[%s8630_s5 + $0x7bc] ss:$28 sps:$4 sm:$0xff]  }
 0x2e5   :  { %5719 = vmatpush3.bf16.msra.mxu0 %v6526_v31  ;;  %4144 = vmatprep.subr.bf16.mxu1 %v6529_v32  ;;  %v6572_v31 = vld [vmem:[%s8630_s5 + $0x7b8] ss:$28 sps:$4 sm:$0xff]  }
 0x2e6   :  { %5720 = vmatprep.subr.bf16.mxu0 %v6530_v34  ;;  %v6577_v32 = vld [vmem:[%s8630_s5 + $0x7f4] ss:$28 sps:$4 sm:$0xff]  }
 0x2e7   :  { %v6575_v34 = vld [vmem:[%s8630_s5 + $0x7f0] ss:$28 sps:$4 sm:$0xff]  }
 0x2e8   :  { %4145 = vmatpush1.bf16.msra.mxu1 %v6527_v35  ;;  %v6580_v35 = vld [vmem:[%s8630_s5 + $0x82c] ss:$28 sps:$4 sm:$0xff]  }
 0x2e9   :  { %5721 = vmatpush3.bf16.msra.mxu0 %v6531_v36  ;;  %4146 = vmatprep.subr.bf16.mxu1 %v6534_v37  ;;  %v6578_v36 = vld [vmem:[%s8630_s5 + $0x828] ss:$28 sps:$4 sm:$0xff]  }
 0x2ea   :  { %5722 = vmatprep.subr.bf16.mxu0 %v6535_v39  ;;  %v6583_v37 = vld [vmem:[%s8630_s5 + $0x864] ss:$28 sps:$4 sm:$0xff]  }
 0x2eb   :  { %v6581_v39 = vld [vmem:[%s8630_s5 + $0x860] ss:$28 sps:$4 sm:$0xff]  }
 0x2ec   :  { %4147 = vmatpush1.bf16.msra.mxu1 %v6532_v27  ;;  %v6586_v27 = vld [vmem:[%s8630_s5 + $0x89c] ss:$28 sps:$4 sm:$0xff]  }
 0x2ed   :  { %5723 = vmatpush3.bf16.msra.mxu0 %v6536_v40  ;;  %4148 = vmatprep.subr.bf16.mxu1 %v6539_v45  ;;  %v6584_v40 = vld [vmem:[%s8630_s5 + $0x898] ss:$28 sps:$4 sm:$0xff]  }
 0x2ee   :  { %5829 = vmatprep.subr.bf16.mxu0 %v6728_v1  ;;  %v6589_v45 = vld [vmem:[%s8630_s5 + $0x8d4] ss:$28 sps:$4 sm:$0xff]  }
 0x2f0   :  { %4368 = vmatmul.mubr.bf16.vlgmr.msra.gmra.mrb[24].mxu0 %v7939_v33  ;;  %4149 = vmatpush1.bf16.msra.mxu1 %v6537_v46  ;;  %v6587_v46 = vld [vmem:[%s8630_s5 + $0x8d0] ss:$28 sps:$4 sm:$0xff]  }
 0x2f1   :  { %5830 = vmatpush3.bf16.msra.mxu0 %v6540_v38  ;;  %4150 = vmatprep.subr.bf16.mxu1 %v6543_v43  ;;  %v6592_v38 = vld [vmem:[%s8630_s5 + $0x90c] ss:$28 sps:$4 sm:$0xff]  }
 0x2f2   :  { %5831 = vmatprep.subr.bf16.mxu0 %v6728_v1  ;;  %5833 = vmatprep.mubr.msk.bf16.mxu0 %vm6729_vm0, %v6728_v1  ;;  %v6590_v43 = vld [vmem:[%s8630_s5 + $0x908] ss:$28 sps:$4 sm:$0xff]  }
 0x2f4   :  { %4151 = vmatpush1.bf16.msra.mxu1 %v6541_v50  ;;  %v6595_v50 = vld [vmem:[%s8630_s5 + $0x944] ss:$28 sps:$4 sm:$0xff]  }
 0x2f5   :  { %5832 = vmatpush3.bf16.msra.mxu0 %v6544_v51  ;;  %4152 = vmatprep.subr.bf16.mxu1 %v6547_v19  ;;  %v6593_v51 = vld [vmem:[%s8630_s5 + $0x940] ss:$28 sps:$4 sm:$0xff]  }
 0x2f6   :  { %5733 = vmatprep.subr.bf16.mxu0 %v6617_v52  ;;  %v6598_v19 = vld [vmem:[%s8630_s5 + $0x97c] ss:$28 sps:$4 sm:$0xff]  }
 0x2f7   :  { %v6596_v52 = vld [vmem:[%s8630_s5 + $0x978] ss:$28 sps:$4 sm:$0xff]  }
 0x2f8   :  { %5834 = vmatmul.mubr.msk.bf16.vlgmr.msra.gmra.mrb[28].mxu0 %vm1144_vm3, %v7971_v48  ;;  %4153 = vmatpush1.bf16.msra.mxu1 %v6545_v54  ;;  %v6601_v54 = vld [vmem:[%s8630_s5 + $0x9b4] ss:$28 sps:$4 sm:$0xff]  }
 0x2f9   :  { %4154 = vmatprep.subr.bf16.mxu1 %v6550_v55  ;;  %5734 = vmatpush3.bf16.msra.mxu0 %v6618_v57  ;;  %v6599_v55 = vld [vmem:[%s8630_s5 + $0x9b0] ss:$28 sps:$4 sm:$0xff]  }
 0x2fa   :  { %5735 = vmatprep.subr.bf16.mxu0 %v6619_v53  ;;  %v6604_v57 = vld [vmem:[%s8630_s5 + $0x9ec] ss:$28 sps:$4 sm:$0xff]  }
 0x2fb   :  { %v6602_v53 = vld [vmem:[%s8630_s5 + $0x9e8] ss:$28 sps:$4 sm:$0xff]  }
 0x2fc   :  { %4155 = vmatpush1.bf16.msra.mxu1 %v6548_v58  ;;  %v6607_v58 = vld [vmem:[%s8630_s5 + $0xa24] ss:$28 sps:$4 sm:$0xff]  }
 0x2fd   :  { %4156 = vmatprep.subr.bf16.mxu1 %v6553_v60  ;;  %5736 = vmatpush3.bf16.msra.mxu0 %v6620_v61  ;;  %v6605_v60 = vld [vmem:[%s8630_s5 + $0xa20] ss:$28 sps:$4 sm:$0xff]  }
 0x2fe   :  { %5737 = vmatprep.subr.bf16.mxu0 %v6621_v62  ;;  %v6610_v61 = vld [vmem:[%s8630_s5 + $0xa5c] ss:$28 sps:$4 sm:$0xff]  }
 0x2ff   :  { %v6608_v62 = vld [vmem:[%s8630_s5 + $0xa58] ss:$28 sps:$4 sm:$0xff]  }
 0x300   :  { %4157 = vmatpush1.bf16.msra.mxu1 %v6551_v63  ;;  %v6613_v63 = vld [vmem:[%s8630_s5 + $0xa94] ss:$28 sps:$4 sm:$0xff]  }
 0x301   :  { %4158 = vmatprep.subr.bf16.mxu1 %v6556_v0  ;;  %5738 = vmatpush3.bf16.msra.mxu0 %v6622_v2  ;;  %v6611_v0 = vld [vmem:[%s8630_s5 + $0xa90] ss:$28 sps:$4 sm:$0xff]  }
 0x302   :  { %5739 = vmatprep.subr.bf16.mxu0 %v6623_v6  ;;  %v6616_v2 = vld [vmem:[%s8630_s5 + $0xacc] ss:$28 sps:$4 sm:$0xff]  }
 0x303   :  { %v6614_v6 = vld [vmem:[%s8630_s5 + $0xac8] ss:$28 sps:$4 sm:$0xff]  }
 0x304   :  { %4159 = vmatpush1.bf16.msra.mxu1 %v6554_v10  ;;  %v8491_v10 = vld [vmem:[%s8631_s6] sm:$0x7f] }
 0x305   :  { %4160 = vmatprep.subr.bf16.mxu1 %v6559_v11  ;;  %5740 = vmatpush3.bf16.msra.mxu0 %v6624_v12  ;;  %v1932_v11 = vrot.slane %v8491_v10, %v6996_v9 }
 0x306   :  { %5741 = vmatprep.subr.bf16.mxu0 %v6625_v13 }
 0x308   :  { %4161 = vmatpush1.bf16.msra.mxu1 %v6557_v14 }
 0x309   :  { %4162 = vmatprep.subr.bf16.mxu1 %v6562_v56  ;;  %5742 = vmatpush3.bf16.msra.mxu0 %v6626_v44 }
 0x30a   :  { %5743 = vmatprep.subr.bf16.mxu0 %v6627_v15 }
 0x30c   :  { %4163 = vmatpush1.bf16.msra.mxu1 %v6560_v16 }
 0x30d   :  { %4173 = vmatprep.subr.bf16.mxu1 %v6565_v17  ;;  %5744 = vmatpush3.bf16.msra.mxu0 %v6628_v18 }
 0x30e   :  { %5745 = vmatprep.subr.bf16.mxu0 %v6629_v20 }
 0x30f   :  { %4165 = vmatmul.mubr.bf16.vlgmr.msra.gmra.mrb[24].mxu1 %v7720_v41  ;;  %v6633_v41 = vld [vmem:[%s8632_s7 + $0xc0] sm:$0xff]  }
 0x310   :  { %4174 = vmatpush1.bf16.msra.mxu1 %v6563_v21  ;;  %4205 = vmatprep.mubr.bf16.mxu1 %v7730_v47  ;;  %v6569_v47 = vld [vmem:[%s8630_s5 + $0x780] ss:$28 sps:$4 sm:$0xff]  }
 0x311   :  { %4175 = vmatprep.subr.bf16.mxu1 %v6568_v22  ;;  %5746 = vmatpush3.bf16.msra.mxu0 %v6630_v23 }
 0x312   :  { %5747 = vmatprep.subr.bf16.mxu0 %v6631_v24 }
 0x314   :  { %4176 = vmatpush1.bf16.msra.mxu1 %v6566_v25 }
 0x315   :  { %4177 = vmatprep.subr.bf16.mxu1 %v6571_v26  ;;  %5748 = vmatpush3.bf16.msra.mxu0 %v6632_v28 }
 0x316   :  { %5755 = vmatprep.subr.bf16.mxu0 %v6633_v41  ;;  %v1936_v41 = vrot.slane %v8491_v10, %v6990_v7 }
 0x318   :  { %4178 = vmatpush1.bf16.msra.mxu1 %v6569_v47 }
 0x319   :  { %4179 = vmatprep.subr.bf16.mxu1 %v6574_v29 }
 0x31c   :  { %4180 = vmatpush1.bf16.msra.mxu1 %v6572_v31 }
 0x31d   :  { %4181 = vmatprep.subr.bf16.mxu1 %v6577_v32 }
 0x320   :  { %4182 = vmatpush1.bf16.msra.mxu1 %v6575_v34 }
 0x321   :  { %4183 = vmatprep.subr.bf16.mxu1 %v6580_v35  ;;  %v6634_v35 = vld [vmem:[%s8632_s7 + $0x80] sm:$0xff]  }
 0x324   :  { %4184 = vmatpush1.bf16.msra.mxu1 %v6578_v36 }
 0x325   :  { %4185 = vmatprep.subr.bf16.mxu1 %v6583_v37 }
 0x328   :  { %4186 = vmatpush1.bf16.msra.mxu1 %v6581_v39 }
 0x329   :  { %4187 = vmatprep.subr.bf16.mxu1 %v6586_v27  ;;  %v6635_v27 = vld [vmem:[%s8632_s7 + $0xc8] sm:$0xff]  }
 0x32c   :  { %4188 = vmatpush1.bf16.msra.mxu1 %v6584_v40  ;;  %v6636_v40 = vld [vmem:[%s8632_s7 + $0x88] sm:$0xff]  }
 0x32d   :  { %4189 = vmatprep.subr.bf16.mxu1 %v6589_v45 }
 0x330   :  { %4190 = vmatpush1.bf16.msra.mxu1 %v6587_v46  ;;  %v6637_v46 = vld [vmem:[%s8632_s7 + $0xd0] sm:$0xff]  }
 0x331   :  { %4191 = vmatprep.subr.bf16.mxu1 %v6592_v38  ;;  %v6638_v38 = vld [vmem:[%s8632_s7 + $0x90] sm:$0xff]  }
 0x334   :  { %4192 = vmatpush1.bf16.msra.mxu1 %v6590_v43 }
 0x335   :  { %4193 = vmatprep.subr.bf16.mxu1 %v6595_v50 }
 0x338   :  { %4194 = vmatpush1.bf16.msra.mxu1 %v6593_v51  ;;  %v6639_v51 = vld [vmem:[%s8632_s7 + $0xd8] sm:$0xff]  }
 0x339   :  { %4195 = vmatprep.subr.bf16.mxu1 %v6598_v19 }
 0x33c   :  { %4196 = vmatpush1.bf16.msra.mxu1 %v6596_v52 }
 0x33d   :  { %4197 = vmatprep.subr.bf16.mxu1 %v6601_v54 }
 0x340   :  { %4198 = vmatpush1.bf16.msra.mxu1 %v6599_v55 }
 0x341   :  { %4199 = vmatprep.subr.bf16.mxu1 %v6604_v57  ;;  %v6640_v57 = vld [vmem:[%s8632_s7 + $0x98] sm:$0xff]  }
 0x344   :  { %4200 = vmatpush1.bf16.msra.mxu1 %v6602_v53  ;;  %v6641_v53 = vld [vmem:[%s8632_s7 + $0xe0] sm:$0xff]  }
 0x345   :  { %4201 = vmatprep.subr.bf16.mxu1 %v6607_v58  ;;  %v6642_v58 = vld [vmem:[%s8632_s7 + $0xa0] sm:$0xff]  }
 0x348   :  { %4202 = vmatpush1.bf16.msra.mxu1 %v6605_v60  ;;  %v6643_v60 = vld [vmem:[%s8632_s7 + $0xe8] sm:$0xff]  }
 0x349   :  { %4203 = vmatprep.subr.bf16.mxu1 %v6610_v61  ;;  %v6644_v61 = vld [vmem:[%s8632_s7 + $0xa8] sm:$0xff]  }
 0x34c   :  { %4204 = vmatpush1.bf16.msra.mxu1 %v6608_v62  ;;  %v6645_v62 = vld [vmem:[%s8632_s7 + $0xf0] sm:$0xff]  }
 0x34d   :  { %4214 = vmatprep.subr.bf16.mxu1 %v6613_v63 }
 0x34f   :  { %4206 = vmatmul.mubr.bf16.vlgmr.msra.gmra.mrb[24].mxu1 %v7939_v33  ;;  %v6649_v33 = vld [vmem:[%s8632_s7 + $0x180] sm:$0xff]  }
 0x350   :  { %4215 = vmatpush1.bf16.msra.mxu1 %v6611_v0  ;;  %4246 = vmatprep.mubr.bf16.mxu1 %v6730_v5  ;;  %v1928_v5 = vrot.slane %v8491_v10, %v6993_v8  ;;  %v6646_v0 = vld [vmem:[%s8632_s7 + $0xb0] sm:$0xff]  }
 0x351   :  { %4216 = vmatprep.subr.bf16.mxu1 %v6616_v2  ;;  %v6647_v2 = vld [vmem:[%s8632_s7 + $0xf8] sm:$0xff]  }
 0x354   :  { %4217 = vmatpush1.bf16.msra.mxu1 %v6614_v6 }
 0x355   :  { %5837 = vmatprep.subr.bf16.mxu1 %v6728_v1 }
 0x35b   :  { %5570 = vmatmul.mubr.msk.bf16.vlgmr.msra.gmra.mrb[24].mxu1 %vm1144_vm3, %v7971_v48  ;;  %v1940_v48 = vrot.slane %v8491_v10, %v475_v42 }
 0x35c   :  { %5839 = vmatprep.mubr.msk.bf16.mxu1 %vm6729_vm0, %v6728_v1  ;;  %5838 = vmatpush3.bf16.msra.mxu1 %v6649_v33  ;;  %v6648_v33 = vld [vmem:[%s8632_s7 + $0xb8] sm:$0xff]  }
 0x362   :  { %v3920_v12 = vpop.f32.mrb[20].mxu1  ;;  %v4084_v13 = vpop.f32.mrb[12].mxu0 }
 0x363   :  { %v5851_v14 = vadd.f32 %v3920_v12, %v1928_v5  ;;  %v3922_v56 = vpop.f32.mrb[21].mxu1  ;;  %v4086_v1 = vpop.f32.mrb[13].mxu0  ;;  %v5853_v39 = vadd.f32 %v4084_v13, %v1936_v41  ;;  %v6650_v5 = vld [vmem:[%s8632_s7 + $0x140] sm:$0xff]   ;;  %v6652_v13 = vld [vmem:[%s8632_s7 + $0x148] sm:$0xff]  }
 0x364   :  { %v5852_v44 = vadd.f32 %v3922_v56, %v1932_v11  ;;  %v5854_v15 = vadd.f32 %v4086_v1, %v1940_v48  ;;  %v3924_v16 = vpop.f32.mrb[22].mxu1  ;;  %v4088_v17 = vpop.f32.mrb[14].mxu0  ;;  %v6651_v48 = vld [vmem:[%s8632_s7 + $0x100] sm:$0xff]   ;;  %v1952_v56 = vrot.slane %v8491_v10, %v487_v59  ;;  %v6656_v59 = vld [vmem:[%s8632_s7 + $0x158] sm:$0xff]  }
 0x365   :  { %v4422_v18 = vmin.f32 %v5851_v14, 0.0  ;;  %v3925_v20 = vpop.f32.mrb[23].mxu1  ;;  %v4089_v8 = vpop.f32.mrb[15].mxu0  ;;  %vm4415_vm12 = vcmp.gt.f32.partialorder %v5851_v14, 0.0  ;;  %v4424_v45 = vmin.f32 %v5853_v39, 0.0  ;;  %vm4417_vm15 = vcmp.gt.f32.partialorder %v5853_v39, 0.0 }
 0x366   :  { %v4423_v21 = vmin.f32 %v5852_v44, 0.0  ;;  %v4425_v22 = vmin.f32 %v5854_v15, 0.0  ;;  %vm4416_vm13 = vcmp.gt.f32.partialorder %v5852_v44, 0.0  ;;  %vm4418_vm14 = vcmp.gt.f32.partialorder %v5854_v15, 0.0  ;;  %v6654_v8 = vld [vmem:[%s8632_s7 + $0x150] sm:$0xff]  }
 0x367   :  { %v4429_v23 = vmul.f32 1.442695, %v4422_v18  ;;  %v4433_v43 = vmul.f32 1.442695, %v4424_v45 }
 0x368   :  { %v4431_v9 = vmul.f32 1.442695, %v4423_v21  ;;  %v4435_v24 = vmul.f32 1.442695, %v4425_v22  ;;  %v6655_v21 = vld [vmem:[%s8632_s7 + $0x110] sm:$0xff]   ;;  %v6657_v22 = vld [vmem:[%s8632_s7 + $0x118] sm:$0xff]  }
 0x369   :  { %6686 = vpow2.f32 %v4429_v23  ;;  %v6658_v23 = vld [vmem:[%s8632_s7 + $0x160] sm:$0xff]  }
 0x36a   :  { %6688 = vpow2.f32 %v4431_v9  ;;  %v6659_v9 = vld [vmem:[%s8632_s7 + $0x120] sm:$0xff]  }
 0x36b   :  { %6690 = vpow2.f32 %v4435_v24  ;;  %v6660_v24 = vld [vmem:[%s8632_s7 + $0x168] sm:$0xff]  }
 0x36c   :  { %6692 = vpow2.f32 %v4433_v43 }
 0x373   :  { %v6687_v42 = vpop.eup %6686 }
 0x374   :  { %v5572_v25 = vadd.f32 -1.0, %v6687_v42  ;;  %v6689_v26 = vpop.eup %6688  ;;  %v6661_v42 = vld [vmem:[%s8632_s7 + $0x128] sm:$0xff]  }
 0x375   :  { %v6691_v28 = vpop.eup %6690  ;;  %v5573_v47 = vadd.f32 -1.0, %v6689_v26  ;;  %v6663_v26 = vld [vmem:[%s8632_s7 + $0x130] sm:$0xff]  }
 0x376   :  { %v4450_v29 = vsel %vm4415_vm12, %v5851_v14, %v5572_v25  ;;  %v5575_v31 = vadd.f32 -1.0, %v6691_v28  ;;  %v6693_v63 = vpop.eup %6692  ;;  %v6653_v14 = vld [vmem:[%s8632_s7 + $0x108] sm:$0xff]   ;;  %v6662_v25 = vld [vmem:[%s8632_s7 + $0x170] sm:$0xff]   ;;  %v6664_v28 = vld [vmem:[%s8632_s7 + $0x178] sm:$0xff]  }
 0x377   :  { %v4451_v32 = vsel %vm4416_vm13, %v5852_v44, %v5573_v47  ;;  %v4457_v37 = vpack.c.bf16 %v4450_v29, %v4450_v29  ;;  %v5574_v6 = vadd.f32 -1.0, %v6693_v63  ;;  %v6665_v47 = vld [vmem:[%s8632_s7 + $0x138] sm:$0xff]  }
 0x378   :  { %v4458_v34 = vpack.c.bf16 %v4451_v32, %v4451_v32  ;;  %v4453_v36 = vsel %vm4418_vm14, %v5854_v15, %v5575_v31 }
 0x379   :  { %v4460_v7 = vpack.c.bf16 %v4453_v36, %v4453_v36  ;;  %v4452_v11 = vsel %vm4417_vm15, %v5853_v39, %v5574_v6 }
 0x37a   :  { %4899 = vmatprep.mubr.bf16.mxu0 %v4458_v34  ;;  %v4459_v12 = vpack.c.bf16 %v4452_v11, %v4452_v11 }
 0x37b   :  { %4900 = vmatmul.mubr.bf16.vlgmr.msra.gmra.mrb[32].mxu0 %v4457_v37 }
 0x37c   :  { %5756 = vmatpush3.bf16.msra.mxu0 %v6634_v35  ;;  %4939 = vmatprep.mubr.bf16.mxu0 %v4460_v7 }
 0x37d   :  { %5757 = vmatprep.subr.bf16.mxu0 %v6635_v27 }
 0x380   :  { %5758 = vmatpush3.bf16.msra.mxu0 %v6636_v40 }
 0x381   :  { %5759 = vmatprep.subr.bf16.mxu0 %v6637_v46 }
 0x382   :  { %v5680_v50 = vpop.f32.mrb[16].mxu0 }
 0x383   :  { %v5681_v19 = vpop.f32.mrb[17].mxu0 }
 0x384   :  { %v5682_v52 = vadd.f32 %v5681_v19, %v5680_v50  ;;  %v5683_v54 = vpop.f32.mrb[18].mxu0  ;;  %5760 = vmatpush3.bf16.msra.mxu0 %v6638_v38  ;;  %v1948_v19 = vrot.slane %v8491_v10, %v483_v49 }
 0x385   :  { %v5684_v55 = vpop.f32.mrb[19].mxu0  ;;  %5761 = vmatprep.subr.bf16.mxu0 %v6639_v51  ;;  %v1944_v51 = vrot.slane %v8491_v10, %v479_v30 }
 0x386   :  { %v4290_v15 = vadd.f32 %v5682_v52, %v1952_v56 }
 0x388   :  { %5762 = vmatpush3.bf16.msra.mxu0 %v6640_v57 }
 0x389   :  { %5763 = vmatprep.subr.bf16.mxu0 %v6641_v53 }
 0x38c   :  { %5764 = vmatpush3.bf16.msra.mxu0 %v6642_v58 }
 0x38d   :  { %5765 = vmatprep.subr.bf16.mxu0 %v6643_v60 }
 0x390   :  { %5766 = vmatpush3.bf16.msra.mxu0 %v6644_v61 }
 0x391   :  { %5767 = vmatprep.subr.bf16.mxu0 %v6645_v62 }
 0x394   :  { %5768 = vmatpush3.bf16.msra.mxu0 %v6646_v0 }
 0x395   :  { %5769 = vmatprep.subr.bf16.mxu0 %v6647_v2 }
 0x398   :  { %5770 = vmatpush3.bf16.msra.mxu0 %v6648_v33 }
 0x399   :  { %5777 = vmatprep.subr.bf16.mxu0 %v6650_v5 }
 0x39b   :  { %4940 = vmatmul.mubr.bf16.vlgmr.msra.gmra.mrb[36].mxu0 %v4459_v12 }
 0x39c   :  { %5778 = vmatpush3.bf16.msra.mxu0 %v6651_v48 }
 0x39d   :  { %5779 = vmatprep.subr.bf16.mxu0 %v6652_v13 }
 0x3a0   :  { %5780 = vmatpush3.bf16.msra.mxu0 %v6653_v14  ;;  %v5579_v14 = vld [vmem:[%s8633_s8] ss:$0 sm:$0xff]  ;;  %s6731_s8 = smov [#allocation2]  }
 0x3a1   :  { %5781 = vmatprep.subr.bf16.mxu0 %v6654_v8  ;;  %s5046_s28 = sshll.u32 %s6731_s8, 4  ;;  %s5047_s28 = int_to_ptr.vmem [resolvable:$true] %s5046_s28 }
 0x3a2   :  { %v5702_v1 = vpop.f32.mrb[20].mxu0  ;;  %s6704_s29 = scalar_lea.vmem %s5047_s28, 128  ;;  %p6709_p1 = scmp.lt.s32.totalorder %s5047_s28, %s5047_s28 }
 0x3a3   :  { %v5703_v44 = vpop.f32.mrb[21].mxu0  ;;  %p6705_p0 = scmp.ne.s32.totalorder %s5047_s28, %s6704_s29  ;;  %p6710_p2 = scmp.lt.s32.totalorder %s6704_s29, %s6704_s29 }
 0x3a4   :  { %v5704_v16 = vadd.f32 %v5703_v44, %v5702_v1  ;;  %v5705_v17 = vpop.f32.mrb[22].mxu0  ;;  %5782 = vmatpush3.bf16.msra.mxu0 %v6655_v21 }
 0x3a5   :  { %v5706_v18 = vpop.f32.mrb[23].mxu0  ;;  %5783 = vmatprep.subr.bf16.mxu0 %v6656_v59  ;;  %p6711_p3 = por %p6710_p2, %p6709_p1 }
 0x3a6   :  { %v4330_v20 = vadd.f32 %v5704_v16, %v4290_v15 }
 0x3a7   :  { %p6712_p4 = pnand %p6711_p3, %p6705_p0 }
 0x3a8   :  { %5784 = vmatpush3.bf16.msra.mxu0 %v6657_v22 }
 0x3a9   :  { %5785 = vmatprep.subr.bf16.mxu0 %v6658_v23 }
 0x3ac   :  { %5786 = vmatpush3.bf16.msra.mxu0 %v6659_v9 }
 0x3ad   :  { %5787 = vmatprep.subr.bf16.mxu0 %v6660_v24 }
 0x3b0   :  { %5788 = vmatpush3.bf16.msra.mxu0 %v6661_v42 }
 0x3b1   :  { %5789 = vmatprep.subr.bf16.mxu0 %v6662_v25 }
 0x3b4   :  { %5790 = vmatpush3.bf16.msra.mxu0 %v6663_v26 }
 0x3b5   :  { %5791 = vmatprep.subr.bf16.mxu0 %v6664_v28 }
 0x3b8   :  { %5792 = vmatpush3.bf16.msra.mxu0 %v6665_v47 }
 0x3c3   :  { %v5724_v41 = vpop.f32.mrb[24].mxu0 }
 0x3c4   :  { %v5725_v29 = vpop.f32.mrb[25].mxu0 }
 0x3c5   :  { %v5726_v31 = vadd.f32 %v5725_v29, %v5724_v41  ;;  %v5727_v32 = vpop.f32.mrb[26].mxu0 }
 0x3c6   :  { %v5728_v34 = vpop.f32.mrb[27].mxu0 }
 0x3c7   :  { %v4370_v35 = vadd.f32 %v5726_v31, %v4330_v20  ;;  %v5028_v31 = vand.u32 127, %v70_v3 }
 0x3c9   :  { %vm5029_vm4 = vcmp.ge.s32.totalorder %v5028_v31, 64 }
 0x3cb   :  { %v4409_v36 = vpop.f32.mrb[28].mxu0 }
 0x3cc   :  { %v4410_v37 = vadd.f32 %v4409_v36, %v4370_v35  ;;  %v5835_v39 = vpop.f32.mrb[29].mxu0 }
 0x3cd   :  { %v4412_v27 = vpop.f32.mrb[30].mxu0 }
 0x3ce   :  { %v4428_v7 = vmin.f32 %v4410_v37, 0.0  ;;  %v5836_v40 = vpop.f32.mrb[31].mxu0  ;;  %vm4421_vm0 = vcmp.gt.f32.partialorder %v4410_v37, 0.0 }
 0x3d0   :  { %v4441_v45 = vmul.f32 1.442695, %v4428_v7 }
 0x3d2   :  { %6694 = vpow2.f32 %v4441_v45 }
 0x3dc   :  { %v6695_v46 = vpop.eup %6694 }
 0x3dd   :  { %v5578_v38 = vadd.f32 -1.0, %v6695_v46 }
 0x3df   :  { %v4456_v43 = vsel %vm4421_vm0, %v4410_v37, %v5578_v38 }
 0x3e0   :  { %v4463_v50 = vpack.c.bf16 %v4456_v43, %v4456_v43 }
 0x3e2   :  { %5840 = vmatmul.mubr.msk.bf16.vlgmr.msra.gmra.mrb[28].mxu1 %vm4863_vm1, %v4463_v50 }
 0x42e   :  { %v4248_v52 = vpop.f32.mrb[24].mxu1 }
 0x42f   :  { %v5855_v54 = vadd.f32 %v4248_v52, %v1944_v51  ;;  %v4250_v55 = vpop.f32.mrb[25].mxu1 }
 0x430   :  { %v5856_v57 = vadd.f32 %v4250_v55, %v1948_v19  ;;  %v4252_v53 = vpop.f32.mrb[26].mxu1 }
 0x431   :  { %v4426_v58 = vmin.f32 %v5855_v54, 0.0  ;;  %v4253_v60 = vpop.f32.mrb[27].mxu1  ;;  %vm4419_vm2 = vcmp.gt.f32.partialorder %v5855_v54, 0.0 }
 0x432   :  { %v4427_v61 = vmin.f32 %v5856_v57, 0.0  ;;  %vm4420_vm3 = vcmp.gt.f32.partialorder %v5856_v57, 0.0 }
 0x433   :  { %v4437_v62 = vmul.f32 1.442695, %v4426_v58 }
 0x434   :  { %v4439_v63 = vmul.f32 1.442695, %v4427_v61 }
 0x435   :  { %6696 = vpow2.f32 %v4437_v62 }
 0x436   :  { %6698 = vpow2.f32 %v4439_v63 }
 0x43f   :  { %v6697_v0 = vpop.eup %6696 }
 0x440   :  { %v6699_v2 = vpop.eup %6698  ;;  %v5576_v6 = vadd.f32 -1.0, %v6697_v0 }
 0x441   :  { %v5577_v30 = vadd.f32 -1.0, %v6699_v2 }
 0x442   :  { %v4454_v4 = vsel %vm4419_vm2, %v5855_v54, %v5576_v6 }
 0x443   :  { %v4455_v49 = vsel %vm4420_vm3, %v5856_v57, %v5577_v30  ;;  %v4461_v33 = vpack.c.bf16 %v4454_v4, %v4454_v4 }
 0x444   :  { %v4462_v10 = vpack.c.bf16 %v4455_v49, %v4455_v49 }
 0x446   :  { %4979 = vmatprep.mubr.bf16.mxu0 %v4462_v10 }
 0x447   :  { %4980 = vmatmul.mubr.bf16.vlgmr.msra.gmra.mrb[40].mxu0 %v4461_v33 }
 0x44e   :  { %v5749_v5 = vpop.f32.mrb[32].mxu0 }
 0x44f   :  { %v5750_v11 = vpop.f32.mrb[33].mxu0 }
 0x450   :  { %v5751_v48 = vadd.f32 %v5750_v11, %v5749_v5  ;;  %v5752_v12 = vpop.f32.mrb[34].mxu0 }
 0x451   :  { %v5753_v13 = vpop.f32.mrb[35].mxu0 }
 0x452   :  { %v4902_v44 = vadd.f32 %v5751_v48, %v5579_v14 }
 0x46e   :  { %v5771_v56 = vpop.f32.mrb[36].mxu0 }
 0x46f   :  { %v5772_v1 = vpop.f32.mrb[37].mxu0 }
 0x470   :  { %v5773_v15 = vadd.f32 %v5772_v1, %v5771_v56  ;;  %v5774_v16 = vpop.f32.mrb[38].mxu0 }
 0x471   :  { %v5775_v17 = vpop.f32.mrb[39].mxu0 }
 0x472   :  { %v4942_v18 = vadd.f32 %v5773_v15, %v4902_v44 }
 0x4b5   :  { %v5021_v20 = vpop.f32.mrb[28].mxu1 }
 0x4b6   :  { %v5841_v8 = vpop.f32.mrb[29].mxu1 }
 0x4b7   :  { %v5024_v21 = vpop.f32.mrb[30].mxu1 }
 0x4b8   :  { %v5842_v59 = vpop.f32.mrb[31].mxu1 }
 0x51a   :  { %v5793_v22 = vpop.f32.mrb[40].mxu0 }
 0x51b   :  { %v5794_v23 = vpop.f32.mrb[41].mxu0 }
 0x51c   :  { %v5795_v9 = vadd.f32 %v5794_v23, %v5793_v22  ;;  %v5796_v24 = vpop.f32.mrb[42].mxu0 }
 0x51d   :  { %v5797_v42 = vpop.f32.mrb[43].mxu0 }
 0x51e   :  { %v4982_v25 = vadd.f32 %v5795_v9, %v4942_v18 }
 0x520   :  { %v5022_v26 = vadd.f32 %v5021_v20, %v4982_v25 }
 0x522   :  { %v5031_v28 = vmin.f32 %v5022_v26, 20.0  ;;  %vm5030_vm5 = vcmp.gt.f32.partialorder %v5022_v26, 20.0 }
 0x524   :  { %v5032_v41 = vmul.f32 1.442695, %v5031_v28 }
 0x526   :  { %6700 = vpow2.f32 %v5032_v41 }
 0x530   :  { %v6701_v47 = vpop.eup %6700 }
 0x531   :  { %v5034_v29 = vadd.f32 1.0, %v6701_v47 }
 0x533   :  { %6702 = vlog2.f32 %v5034_v29 }
 0x53d   :  { %v6703_v32 = vpop.eup %6702 }
 0x53e   :  { %v5036_v34 = vmul.f32 0.6931472, %v6703_v32 }
 0x540   :  { %v5037_v35 = vsel %vm5030_vm5, %v5022_v26, %v5036_v34 }
 0x541   :  { %v5038_v36 = vsel %vm5029_vm4, %v5037_v35, %v5022_v26 }
 0x542   :  { %5039 = vst [vmem:[#allocation2] sm:$0xff] %v5038_v36 }
 0x543   :  { %6715 = shalt.err (!%p6712_p4)
}
 0x544   :  { %s6716_s11 = scalar_lea.hbm %s8634_s9, 128 }
 0x545   :  { %p6717_p5 = scmp.ne.s32.totalorder %s8634_s9, %s6716_s11  ;;  %p6720_p6 = scmp.lt.u32.totalorder %s6716_s11, %s8634_s9 }
 0x547   :  { %p6722_p7 = pnand %p6720_p6, %p6717_p5 }
 0x549   :  { %6725 = shalt.err (!%p6722_p7)
}
 0x54a   :  { %5049 = dma.vmem_to_hbm [thread:$0]  %s5047_s28, 128, %s8634_s9, [#allocation3]  }
 0x54b   :  { %6726 = dma.done.wait [#allocation3], 128  }
 0x54c   :  { %6727 = vsyncadd [#allocation3], 4294967168 }
 0x54d   :  { %5053 = vsyncpa [#allocation3], 1 }

</bundles_post_ra>
